<compile_context>
chip_gen: v7x
topology: tpu7x:2x2x1
jax: 0.10.0
libtpu: 0.0.40
codegen_flags: <defaults>
</compile_context>

<pallas_src>
import numpy as np

import jax
import jax.numpy as jnp
from jax.experimental import pallas as pl
from jax.experimental.pallas import tpu as pltpu


# ---------------------------------------------------------------------------
# Fused kernel
# ---------------------------------------------------------------------------
def _lenet5_kernel(x_ref, w1_ref, b1_ref, w3_ref, b3_ref,
                   w5_ref, b5_ref, w6_ref, b6_ref, w7_ref, b7_ref,
                   o_ref, ps1, s1, ps2, s2):
    """Fused LeNet-5 forward for a block of B images.

    x_ref : (B*32, 32*C) bf16   input slab, row = b*32 + h, lane = w*C + c
    w1/w3 : (5, Win*Cin, 128+OWp*OC) bf16 banded conv weights; even pooled
            output columns in lanes [0, OWp*OC), odd ones in [128, 128+OWp*OC)
            (the 2x2 pool's column max is folded into the weights).
    b1/b3 : (1, OWp*OC) f32     bias tiled over pooled output width
    w5    : (5, 80, 120) bf16   conv5-as-FC, one matrix per 5x5-map row
    w6/w7 : bf16 linear weights; b5/b6/b7 f32 biases
    o_ref : (B, 1, num_classes) f32 logits
    ps1/ps2 : f32 scratch, pre-row-pool conv outputs
    s1      : bf16 scratch, conv1 pooled output (rows b*16 + j, j < 14 valid)
    s2      : f32  scratch, conv3 pooled output (rows b*8  + j, j < 5  valid)
    """
    f32 = jnp.float32
    B = o_ref.shape[0]
    KH = w1_ref.shape[0]                      # 5
    H = x_ref.shape[0] // B                   # 32

    def conv_relu_pool(src, rows_in, w_ref, b_ref, ps, dst, dst_dtype):
        n_out = b_ref.shape[1]                # pooled_width * out_channels
        m = B * rows_in - (KH - 1)            # conv output rows (incl. junk)
        acc = jnp.dot(src[pl.ds(0, m), :], w_ref[0],
                      preferred_element_type=f32)
        for kh in range(1, KH):               # static unroll over the 5 taps
            acc += jnp.dot(src[pl.ds(kh, m), :], w_ref[kh],
                           preferred_element_type=f32)
        off = acc.shape[-1] - n_out           # 128-aligned odd-column block
        # column half of the 2x2 max pool (even vs. odd conv output columns)
        ps[pl.ds(0, m), :] = jnp.maximum(acc[:, :n_out],
                                         acc[:, off:off + n_out])
        # row half of the pool: stride-2 sublane loads pair rows (2t, 2t+1)
        t = m // 2
        pooled = jnp.maximum(ps[pl.ds(0, t, stride=2), :],
                             ps[pl.ds(1, t, stride=2), :])
        # max(relu(x+b)) == relu(max(x)+b) for a shared per-channel bias
        dst[pl.ds(0, t), :] = jnp.maximum(pooled + b_ref[...],
                                          0.0).astype(dst_dtype)

    # conv1 (5x5, C->6) + ReLU + 2x2 pool : 32x32xC -> 14x14x6
    conv_relu_pool(x_ref, H, w1_ref, b1_ref, ps1, s1, jnp.bfloat16)
    # conv3 (5x5, 6->16) + ReLU + 2x2 pool : 14x14x6 -> 5x5x16
    conv_relu_pool(s1, H // 2, w3_ref, b3_ref, ps2, s2, f32)

    # Head: conv5-as-FC (sum of 5 per-row matmuls over the 5x5x16 map),
    # ReLU, f6, ReLU, f7.  Row h of image b sits at s2 row b*8 + h, so a
    # stride-8 sublane load gathers that row for every image at once (M = B).
    r2 = (H // 2) // 2                        # 8 scratch rows per image
    h5 = jnp.dot(s2[pl.ds(0, B, stride=r2), :].astype(jnp.bfloat16),
                 w5_ref[0], preferred_element_type=f32)
    for h in range(1, KH):
        h5 += jnp.dot(s2[pl.ds(h, B, stride=r2), :].astype(jnp.bfloat16),
                      w5_ref[h], preferred_element_type=f32)
    h5 = jnp.maximum(h5 + b5_ref[...], 0.0).astype(jnp.bfloat16)
    h6 = jnp.dot(h5, w6_ref[...], preferred_element_type=f32) + b6_ref[...]
    h6 = jnp.maximum(h6, 0.0).astype(jnp.bfloat16)
    logits = jnp.dot(h6, w7_ref[...], preferred_element_type=f32) + b7_ref[...]
    o_ref[:, 0, :] = logits


# ---------------------------------------------------------------------------
# pallas_call wrapper
# ---------------------------------------------------------------------------
def _pick_batch_block(n):
    if n <= 1:
        return 1
    # >=2 grid steps so both v7x TensorCores get work; cap per-step VMEM.
    return min(128, (n + 1) // 2)


@jax.jit
def lenet5_forward(x, params):
    """x: (N, C, 32, 32) f32 -> (N, num_classes) f32."""
    n, c, h, w = x.shape
    assert (h, w) == (32, 32), "LeNet-5 expects 32x32 inputs"
    nc = params["w7"].shape[1]
    n1 = params["b1"].shape[1]                # 84 = 14*6
    n3 = params["b3"].shape[1]                # 80 = 5*16

    bsz = _pick_batch_block(n)
    grid = -(-n // bsz)
    n_pad = grid * bsz
    if n_pad != n:
        x = jnp.pad(x, ((0, n_pad - n), (0, 0), (0, 0), (0, 0)))

    # NCHW -> lane-dense (N*H, W*C) bf16 slab, row = n*32 + h, lane = w*C + c.
    x2d = jnp.transpose(x, (0, 2, 3, 1)).reshape(n_pad * h, w * c)
    x2d = x2d.astype(jnp.bfloat16)

    args = (x2d, params["w1"], params["b1"], params["w3"], params["b3"],
            params["w5"], params["b5"], params["w6"], params["b6"],
            params["w7"], params["b7"])

    def _full_spec(a):
        zeros = (0,) * a.ndim
        return pl.BlockSpec(a.shape, lambda i, z=zeros: z)

    out = pl.pallas_call(
        _lenet5_kernel,
        out_shape=jax.ShapeDtypeStruct((n_pad, 1, nc), jnp.float32),
        grid=(grid,),
        in_specs=[pl.BlockSpec((bsz * h, w * c), lambda i: (i, 0))]
                 + [_full_spec(a) for a in args[1:]],
        out_specs=pl.BlockSpec((bsz, 1, nc), lambda i: (i, 0, 0)),
        scratch_shapes=[
            pltpu.VMEM((bsz * h, n1), jnp.float32),          # ps1 (pre row-pool)
            pltpu.VMEM((bsz * (h // 2), n1), jnp.bfloat16),  # s1  (conv3 input)
            pltpu.VMEM((bsz * (h // 2), n3), jnp.float32),   # ps2 (pre row-pool)
            pltpu.VMEM((bsz * (h // 4), n3), jnp.float32),   # s2  (head input)
        ],
        compiler_params=pltpu.CompilerParams(
            dimension_semantics=("parallel",)),
    )(*args)
    return out.reshape(n_pad, nc)[:n]


# ---------------------------------------------------------------------------
# One-time weight packing (init time, numpy)
# ---------------------------------------------------------------------------
def _pack_conv_pool(w, b, in_width):
    """PyTorch conv weight (OC, C, 5, 5) -> banded matmul weights with the
    2x2 max-pool's column selection folded in (even pooled output columns at
    lane offset 0, odd at a 128-aligned offset)."""
    oc, c, kh, kw = w.shape
    ow = in_width - kw + 1
    owp = ow // 2
    n_out = owp * oc
    off = 128 * (-(-n_out // 128))            # aligned start of the odd block
    m = np.zeros((kh, in_width * c, off + n_out), np.float32)
    for ikh in range(kh):
        for ikw in range(kw):
            blk = w[:, :, ikh, ikw].T                      # (C, OC)
            for j in range(owp):
                r_even = (2 * j + ikw) * c                 # input lane, even ow
                r_odd = (2 * j + 1 + ikw) * c              # input lane, odd  ow
                m[ikh, r_even:r_even + c, j * oc:(j + 1) * oc] = blk
                m[ikh, r_odd:r_odd + c, off + j * oc:off + (j + 1) * oc] = blk
    bias = np.tile(np.asarray(b), owp)[None, :]
    return jnp.asarray(m, jnp.bfloat16), jnp.asarray(bias, jnp.float32)


def _pack_head(c5_w, c5_b, f6_w, f6_b, f7_w, f7_b):
    # conv5 acts on the 5x5x16 map -> 5 per-row FC matrices, lane = w*16 + c.
    kh = c5_w.shape[2]
    w5 = np.transpose(c5_w, (2, 3, 1, 0)).reshape(kh, -1, c5_w.shape[0])
    return {
        "w5": jnp.asarray(w5, jnp.bfloat16),
        "b5": jnp.asarray(c5_b[None, :], jnp.float32),
        "w6": jnp.asarray(f6_w.T, jnp.bfloat16),   # PyTorch Linear is (out, in)
        "b6": jnp.asarray(f6_b[None, :], jnp.float32),
        "w7": jnp.asarray(f7_w.T, jnp.bfloat16),
        "b7": jnp.asarray(f7_b[None, :], jnp.float32),
    }


def init_params(in_channels, num_classes, key):
    """PyTorch-default U(-1/sqrt(fan_in), 1/sqrt(fan_in)) init.
    Returns (packed kernel params, raw PyTorch-layout weights)."""
    ks = jax.random.split(key, 10)

    def u(k, shape, fan_in):
        bound = 1.0 / np.sqrt(fan_in)
        return np.asarray(jax.random.uniform(k, shape, jnp.float32, -bound, bound))

    raw = {
        "c1_w": u(ks[0], (6, in_channels, 5, 5), in_channels * 25),
        "c1_b": u(ks[1], (6,), in_channels * 25),
        "c3_w": u(ks[2], (16, 6, 5, 5), 6 * 25),
        "c3_b": u(ks[3], (16,), 6 * 25),
        "c5_w": u(ks[4], (120, 16, 5, 5), 16 * 25),
        "c5_b": u(ks[5], (120,), 16 * 25),
        "f6_w": u(ks[6], (84, 120), 120),
        "f6_b": u(ks[7], (84,), 120),
        "f7_w": u(ks[8], (num_classes, 84), 84),
        "f7_b": u(ks[9], (num_classes,), 84),
    }
    w1, b1 = _pack_conv_pool(raw["c1_w"], raw["c1_b"], in_width=32)
    w3, b3 = _pack_conv_pool(raw["c3_w"], raw["c3_b"], in_width=14)
    packed = {"w1": w1, "b1": b1, "w3": w3, "b3": b3}
    packed.update(_pack_head(raw["c5_w"], raw["c5_b"], raw["f6_w"],
                             raw["f6_b"], raw["f7_w"], raw["f7_b"]))
    return packed, raw


# ---------------------------------------------------------------------------
# Pure-JAX f32 reference (mirrors the PyTorch module) for a sanity check
# ---------------------------------------------------------------------------
def _reference_forward(x, raw):
    def conv(v, w, b):
        y = jax.lax.conv_general_dilated(
            v, w, window_strides=(1, 1), padding="VALID",
            dimension_numbers=("NCHW", "OIHW", "NCHW"))
        return y + b[None, :, None, None]

    def pool(v):
        return jax.lax.reduce_window(v, -jnp.inf, jax.lax.max,
                                     (1, 1, 2, 2), (1, 1, 2, 2), "VALID")

    y = pool(jax.nn.relu(conv(x, raw["c1_w"], raw["c1_b"])))
    y = pool(jax.nn.relu(conv(y, raw["c3_w"], raw["c3_b"])))
    y = jax.nn.relu(conv(y, raw["c5_w"], raw["c5_b"])).reshape(x.shape[0], -1)
    y = jax.nn.relu(y @ raw["f6_w"].T + raw["f6_b"])
    return y @ raw["f7_w"].T + raw["f7_b"]


if __name__ == "__main__":
    key = jax.random.PRNGKey(0)
    k_x, k_p = jax.random.split(key)

    batch, in_channels, num_classes = 2, 1, 10
    x = jax.random.normal(k_x, (batch, in_channels, 32, 32), jnp.float32)
    params, raw = init_params(in_channels, num_classes, k_p)

    out = jax.block_until_ready(lenet5_forward(x, params))
    assert out.shape == (batch, num_classes), out.shape

    ref = _reference_forward(x, raw)
    err = float(jnp.max(jnp.abs(out - ref)))
    assert err < 2e-2, f"max abs error vs f32 reference: {err}"  # bf16 MXU tol
    print("KERNEL_OK")
</pallas_src>

<mosaic_0001>
module attributes {stable_mosaic.version = 11 : i64} {
  func.func @_lenet5_kernel(%arg0: i32, %arg1: memref<32x32xbf16, #tpu.memory_space<vmem>>, %arg2: memref<5x32x212xbf16, #tpu.memory_space<vmem>>, %arg3: memref<1x84xf32, #tpu.memory_space<vmem>>, %arg4: memref<5x84x208xbf16, #tpu.memory_space<vmem>>, %arg5: memref<1x80xf32, #tpu.memory_space<vmem>>, %arg6: memref<5x80x120xbf16, #tpu.memory_space<vmem>>, %arg7: memref<1x120xf32, #tpu.memory_space<vmem>>, %arg8: memref<120x84xbf16, #tpu.memory_space<vmem>>, %arg9: memref<1x84xf32, #tpu.memory_space<vmem>>, %arg10: memref<84x10xbf16, #tpu.memory_space<vmem>>, %arg11: memref<1x10xf32, #tpu.memory_space<vmem>>, %arg12: memref<1x1x10xf32, #tpu.memory_space<vmem>>, %arg13: memref<32x84xf32, #tpu.memory_space<vmem>>, %arg14: memref<16x84xbf16, #tpu.memory_space<vmem>>, %arg15: memref<16x80xf32, #tpu.memory_space<vmem>>, %arg16: memref<8x80xf32, #tpu.memory_space<vmem>>) attributes {dimension_semantics = [#tpu.dimension_semantics<parallel>], iteration_bounds = array<i64: 2>, scalar_prefetch = 0 : i64, scratch_operands = 4 : i64, tpu.core_type = #tpu.core_type<tc>, window_params = [{transform_indices = @transform_0, window_bounds = array<i64: 32, 32>}, {pipeline_mode = #tpu.pipeline_mode<synchronous>, transform_indices = @transform_1, window_bounds = array<i64: 5, 32, 212>}, {pipeline_mode = #tpu.pipeline_mode<synchronous>, transform_indices = @transform_2, window_bounds = array<i64: 1, 84>}, {pipeline_mode = #tpu.pipeline_mode<synchronous>, transform_indices = @transform_3, window_bounds = array<i64: 5, 84, 208>}, {pipeline_mode = #tpu.pipeline_mode<synchronous>, transform_indices = @transform_4, window_bounds = array<i64: 1, 80>}, {pipeline_mode = #tpu.pipeline_mode<synchronous>, transform_indices = @transform_5, window_bounds = array<i64: 5, 80, 120>}, {pipeline_mode = #tpu.pipeline_mode<synchronous>, transform_indices = @transform_6, window_bounds = array<i64: 1, 120>}, {pipeline_mode = #tpu.pipeline_mode<synchronous>, transform_indices = @transform_7, window_bounds = array<i64: 120, 84>}, {pipeline_mode = #tpu.pipeline_mode<synchronous>, transform_indices = @transform_8, window_bounds = array<i64: 1, 84>}, {pipeline_mode = #tpu.pipeline_mode<synchronous>, transform_indices = @transform_9, window_bounds = array<i64: 84, 10>}, {pipeline_mode = #tpu.pipeline_mode<synchronous>, transform_indices = @transform_10, window_bounds = array<i64: 1, 10>}, {transform_indices = @transform_11, window_bounds = array<i64: 1, 1, 10>}]} {
    %c0 = arith.constant 0 : index
    %c0_0 = arith.constant 0 : index
    %0 = vector.load %arg1[%c0, %c0_0] : memref<32x32xbf16, #tpu.memory_space<vmem>>, vector<28x32xbf16>
    %c0_1 = arith.constant 0 : index
    %c0_2 = arith.constant 0 : index
    %c0_3 = arith.constant 0 : index
    %1 = vector.load %arg2[%c0_1, %c0_2, %c0_3] : memref<5x32x212xbf16, #tpu.memory_space<vmem>>, vector<1x32x212xbf16>
    %2 = vector.shape_cast %1 : vector<1x32x212xbf16> to vector<32x212xbf16>
    %cst = arith.constant dense<0.000000e+00> : vector<28x212xf32>
    %3 = tpu.matmul %0, %2, %cst {dimension_numbers = #tpu.dot_dimension_numbers<[1], [0], [0], [1], [0, 0, 1, 1], [], []>} : vector<28x32xbf16>, vector<32x212xbf16>, vector<28x212xf32> -> vector<28x212xf32>
    %c1 = arith.constant 1 : index
    %c0_4 = arith.constant 0 : index
    %4 = vector.load %arg1[%c1, %c0_4] : memref<32x32xbf16, #tpu.memory_space<vmem>>, vector<28x32xbf16>
    %c1_5 = arith.constant 1 : index
    %c0_6 = arith.constant 0 : index
    %c0_7 = arith.constant 0 : index
    %5 = vector.load %arg2[%c1_5, %c0_6, %c0_7] : memref<5x32x212xbf16, #tpu.memory_space<vmem>>, vector<1x32x212xbf16>
    %6 = vector.shape_cast %5 : vector<1x32x212xbf16> to vector<32x212xbf16>
    %cst_8 = arith.constant dense<0.000000e+00> : vector<28x212xf32>
    %7 = tpu.matmul %4, %6, %cst_8 {dimension_numbers = #tpu.dot_dimension_numbers<[1], [0], [0], [1], [0, 0, 1, 1], [], []>} : vector<28x32xbf16>, vector<32x212xbf16>, vector<28x212xf32> -> vector<28x212xf32>
    %8 = arith.addf %3, %7 : vector<28x212xf32>
    %c2 = arith.constant 2 : index
    %c0_9 = arith.constant 0 : index
    %9 = vector.load %arg1[%c2, %c0_9] : memref<32x32xbf16, #tpu.memory_space<vmem>>, vector<28x32xbf16>
    %c2_10 = arith.constant 2 : index
    %c0_11 = arith.constant 0 : index
    %c0_12 = arith.constant 0 : index
    %10 = vector.load %arg2[%c2_10, %c0_11, %c0_12] : memref<5x32x212xbf16, #tpu.memory_space<vmem>>, vector<1x32x212xbf16>
    %11 = vector.shape_cast %10 : vector<1x32x212xbf16> to vector<32x212xbf16>
    %cst_13 = arith.constant dense<0.000000e+00> : vector<28x212xf32>
    %12 = tpu.matmul %9, %11, %cst_13 {dimension_numbers = #tpu.dot_dimension_numbers<[1], [0], [0], [1], [0, 0, 1, 1], [], []>} : vector<28x32xbf16>, vector<32x212xbf16>, vector<28x212xf32> -> vector<28x212xf32>
    %13 = arith.addf %8, %12 : vector<28x212xf32>
    %c3 = arith.constant 3 : index
    %c0_14 = arith.constant 0 : index
    %14 = vector.load %arg1[%c3, %c0_14] : memref<32x32xbf16, #tpu.memory_space<vmem>>, vector<28x32xbf16>
    %c3_15 = arith.constant 3 : index
    %c0_16 = arith.constant 0 : index
    %c0_17 = arith.constant 0 : index
    %15 = vector.load %arg2[%c3_15, %c0_16, %c0_17] : memref<5x32x212xbf16, #tpu.memory_space<vmem>>, vector<1x32x212xbf16>
    %16 = vector.shape_cast %15 : vector<1x32x212xbf16> to vector<32x212xbf16>
    %cst_18 = arith.constant dense<0.000000e+00> : vector<28x212xf32>
    %17 = tpu.matmul %14, %16, %cst_18 {dimension_numbers = #tpu.dot_dimension_numbers<[1], [0], [0], [1], [0, 0, 1, 1], [], []>} : vector<28x32xbf16>, vector<32x212xbf16>, vector<28x212xf32> -> vector<28x212xf32>
    %18 = arith.addf %13, %17 : vector<28x212xf32>
    %c4 = arith.constant 4 : index
    %c0_19 = arith.constant 0 : index
    %19 = vector.load %arg1[%c4, %c0_19] : memref<32x32xbf16, #tpu.memory_space<vmem>>, vector<28x32xbf16>
    %c4_20 = arith.constant 4 : index
    %c0_21 = arith.constant 0 : index
    %c0_22 = arith.constant 0 : index
    %20 = vector.load %arg2[%c4_20, %c0_21, %c0_22] : memref<5x32x212xbf16, #tpu.memory_space<vmem>>, vector<1x32x212xbf16>
    %21 = vector.shape_cast %20 : vector<1x32x212xbf16> to vector<32x212xbf16>
    %cst_23 = arith.constant dense<0.000000e+00> : vector<28x212xf32>
    %22 = tpu.matmul %19, %21, %cst_23 {dimension_numbers = #tpu.dot_dimension_numbers<[1], [0], [0], [1], [0, 0, 1, 1], [], []>} : vector<28x32xbf16>, vector<32x212xbf16>, vector<28x212xf32> -> vector<28x212xf32>
    %23 = arith.addf %18, %22 : vector<28x212xf32>
    %24 = vector.extract_strided_slice %23 {offsets = [0, 0], sizes = [28, 84], strides = [1, 1]} : vector<28x212xf32> to vector<28x84xf32>
    %25 = vector.extract_strided_slice %23 {offsets = [0, 128], sizes = [28, 84], strides = [1, 1]} : vector<28x212xf32> to vector<28x84xf32>
    %26 = arith.maximumf %24, %25 : vector<28x84xf32>
    %c0_24 = arith.constant 0 : index
    %c0_25 = arith.constant 0 : index
    %27 = vector.load %arg13[%c0_24, %c0_25] : memref<32x84xf32, #tpu.memory_space<vmem>>, vector<28x84xf32>
    tpu.vector_store %arg13[%c0_24, %c0_25], %26 {strides = array<i32>} : memref<32x84xf32, #tpu.memory_space<vmem>>, vector<28x84xf32>,
    %c0_26 = arith.constant 0 : index
    %c0_27 = arith.constant 0 : index
    %28 = tpu.strided_load %arg13[%c0_26, %c0_27] {strides = array<i32: 2, 1>} : memref<32x84xf32, #tpu.memory_space<vmem>>, vector<14x84xf32>
    %c1_28 = arith.constant 1 : index
    %c0_29 = arith.constant 0 : index
    %29 = tpu.strided_load %arg13[%c1_28, %c0_29] {strides = array<i32: 2, 1>} : memref<32x84xf32, #tpu.memory_space<vmem>>, vector<14x84xf32>
    %30 = arith.maximumf %28, %29 : vector<14x84xf32>
    %c0_30 = arith.constant 0 : index
    %c0_31 = arith.constant 0 : index
    %31 = vector.load %arg3[%c0_30, %c0_31] : memref<1x84xf32, #tpu.memory_space<vmem>>, vector<1x84xf32>
    %32 = vector.broadcast %31 : vector<1x84xf32> to vector<14x84xf32>
    %33 = arith.addf %30, %32 : vector<14x84xf32>
    %cst_32 = arith.constant 0.000000e+00 : f32
    %34 = vector.broadcast %cst_32 : f32 to vector<14x84xf32>
    %35 = arith.maximumf %33, %34 : vector<14x84xf32>
    %36 = arith.truncf %35 : vector<14x84xf32> to vector<14x84xbf16>
    %c0_33 = arith.constant 0 : index
    %c0_34 = arith.constant 0 : index
    %37 = vector.load %arg14[%c0_33, %c0_34] : memref<16x84xbf16, #tpu.memory_space<vmem>>, vector<14x84xbf16>
    tpu.vector_store %arg14[%c0_33, %c0_34], %36 {strides = array<i32>} : memref<16x84xbf16, #tpu.memory_space<vmem>>, vector<14x84xbf16>,
    %c0_35 = arith.constant 0 : index
    %c0_36 = arith.constant 0 : index
    %38 = vector.load %arg14[%c0_35, %c0_36] : memref<16x84xbf16, #tpu.memory_space<vmem>>, vector<12x84xbf16>
    %c0_37 = arith.constant 0 : index
    %c0_38 = arith.constant 0 : index
    %c0_39 = arith.constant 0 : index
    %39 = vector.load %arg4[%c0_37, %c0_38, %c0_39] : memref<5x84x208xbf16, #tpu.memory_space<vmem>>, vector<1x84x208xbf16>
    %40 = vector.shape_cast %39 : vector<1x84x208xbf16> to vector<84x208xbf16>
    %cst_40 = arith.constant dense<0.000000e+00> : vector<12x208xf32>
    %41 = tpu.matmul %38, %40, %cst_40 {dimension_numbers = #tpu.dot_dimension_numbers<[1], [0], [0], [1], [0, 0, 1, 1], [], []>} : vector<12x84xbf16>, vector<84x208xbf16>, vector<12x208xf32> -> vector<12x208xf32>
    %c1_41 = arith.constant 1 : index
    %c0_42 = arith.constant 0 : index
    %42 = vector.load %arg14[%c1_41, %c0_42] : memref<16x84xbf16, #tpu.memory_space<vmem>>, vector<12x84xbf16>
    %c1_43 = arith.constant 1 : index
    %c0_44 = arith.constant 0 : index
    %c0_45 = arith.constant 0 : index
    %43 = vector.load %arg4[%c1_43, %c0_44, %c0_45] : memref<5x84x208xbf16, #tpu.memory_space<vmem>>, vector<1x84x208xbf16>
    %44 = vector.shape_cast %43 : vector<1x84x208xbf16> to vector<84x208xbf16>
    %cst_46 = arith.constant dense<0.000000e+00> : vector<12x208xf32>
    %45 = tpu.matmul %42, %44, %cst_46 {dimension_numbers = #tpu.dot_dimension_numbers<[1], [0], [0], [1], [0, 0, 1, 1], [], []>} : vector<12x84xbf16>, vector<84x208xbf16>, vector<12x208xf32> -> vector<12x208xf32>
    %46 = arith.addf %41, %45 : vector<12x208xf32>
    %c2_47 = arith.constant 2 : index
    %c0_48 = arith.constant 0 : index
    %47 = vector.load %arg14[%c2_47, %c0_48] : memref<16x84xbf16, #tpu.memory_space<vmem>>, vector<12x84xbf16>
    %c2_49 = arith.constant 2 : index
    %c0_50 = arith.constant 0 : index
    %c0_51 = arith.constant 0 : index
    %48 = vector.load %arg4[%c2_49, %c0_50, %c0_51] : memref<5x84x208xbf16, #tpu.memory_space<vmem>>, vector<1x84x208xbf16>
    %49 = vector.shape_cast %48 : vector<1x84x208xbf16> to vector<84x208xbf16>
    %cst_52 = arith.constant dense<0.000000e+00> : vector<12x208xf32>
    %50 = tpu.matmul %47, %49, %cst_52 {dimension_numbers = #tpu.dot_dimension_numbers<[1], [0], [0], [1], [0, 0, 1, 1], [], []>} : vector<12x84xbf16>, vector<84x208xbf16>, vector<12x208xf32> -> vector<12x208xf32>
    %51 = arith.addf %46, %50 : vector<12x208xf32>
    %c3_53 = arith.constant 3 : index
    %c0_54 = arith.constant 0 : index
    %52 = vector.load %arg14[%c3_53, %c0_54] : memref<16x84xbf16, #tpu.memory_space<vmem>>, vector<12x84xbf16>
    %c3_55 = arith.constant 3 : index
    %c0_56 = arith.constant 0 : index
    %c0_57 = arith.constant 0 : index
    %53 = vector.load %arg4[%c3_55, %c0_56, %c0_57] : memref<5x84x208xbf16, #tpu.memory_space<vmem>>, vector<1x84x208xbf16>
    %54 = vector.shape_cast %53 : vector<1x84x208xbf16> to vector<84x208xbf16>
    %cst_58 = arith.constant dense<0.000000e+00> : vector<12x208xf32>
    %55 = tpu.matmul %52, %54, %cst_58 {dimension_numbers = #tpu.dot_dimension_numbers<[1], [0], [0], [1], [0, 0, 1, 1], [], []>} : vector<12x84xbf16>, vector<84x208xbf16>, vector<12x208xf32> -> vector<12x208xf32>
    %56 = arith.addf %51, %55 : vector<12x208xf32>
    %c4_59 = arith.constant 4 : index
    %c0_60 = arith.constant 0 : index
    %57 = vector.load %arg14[%c4_59, %c0_60] : memref<16x84xbf16, #tpu.memory_space<vmem>>, vector<12x84xbf16>
    %c4_61 = arith.constant 4 : index
    %c0_62 = arith.constant 0 : index
    %c0_63 = arith.constant 0 : index
    %58 = vector.load %arg4[%c4_61, %c0_62, %c0_63] : memref<5x84x208xbf16, #tpu.memory_space<vmem>>, vector<1x84x208xbf16>
    %59 = vector.shape_cast %58 : vector<1x84x208xbf16> to vector<84x208xbf16>
    %cst_64 = arith.constant dense<0.000000e+00> : vector<12x208xf32>
    %60 = tpu.matmul %57, %59, %cst_64 {dimension_numbers = #tpu.dot_dimension_numbers<[1], [0], [0], [1], [0, 0, 1, 1], [], []>} : vector<12x84xbf16>, vector<84x208xbf16>, vector<12x208xf32> -> vector<12x208xf32>
    %61 = arith.addf %56, %60 : vector<12x208xf32>
    %62 = vector.extract_strided_slice %61 {offsets = [0, 0], sizes = [12, 80], strides = [1, 1]} : vector<12x208xf32> to vector<12x80xf32>
    %63 = vector.extract_strided_slice %61 {offsets = [0, 128], sizes = [12, 80], strides = [1, 1]} : vector<12x208xf32> to vector<12x80xf32>
    %64 = arith.maximumf %62, %63 : vector<12x80xf32>
    %c0_65 = arith.constant 0 : index
    %c0_66 = arith.constant 0 : index
    %65 = vector.load %arg15[%c0_65, %c0_66] : memref<16x80xf32, #tpu.memory_space<vmem>>, vector<12x80xf32>
    tpu.vector_store %arg15[%c0_65, %c0_66], %64 {strides = array<i32>} : memref<16x80xf32, #tpu.memory_space<vmem>>, vector<12x80xf32>,
    %c0_67 = arith.constant 0 : index
    %c0_68 = arith.constant 0 : index
    %66 = tpu.strided_load %arg15[%c0_67, %c0_68] {strides = array<i32: 2, 1>} : memref<16x80xf32, #tpu.memory_space<vmem>>, vector<6x80xf32>
    %c1_69 = arith.constant 1 : index
    %c0_70 = arith.constant 0 : index
    %67 = tpu.strided_load %arg15[%c1_69, %c0_70] {strides = array<i32: 2, 1>} : memref<16x80xf32, #tpu.memory_space<vmem>>, vector<6x80xf32>
    %68 = arith.maximumf %66, %67 : vector<6x80xf32>
    %c0_71 = arith.constant 0 : index
    %c0_72 = arith.constant 0 : index
    %69 = vector.load %arg5[%c0_71, %c0_72] : memref<1x80xf32, #tpu.memory_space<vmem>>, vector<1x80xf32>
    %70 = vector.broadcast %69 : vector<1x80xf32> to vector<6x80xf32>
    %71 = arith.addf %68, %70 : vector<6x80xf32>
    %cst_73 = arith.constant 0.000000e+00 : f32
    %72 = vector.broadcast %cst_73 : f32 to vector<6x80xf32>
    %73 = arith.maximumf %71, %72 : vector<6x80xf32>
    %c0_74 = arith.constant 0 : index
    %c0_75 = arith.constant 0 : index
    %74 = vector.load %arg16[%c0_74, %c0_75] : memref<8x80xf32, #tpu.memory_space<vmem>>, vector<6x80xf32>
    tpu.vector_store %arg16[%c0_74, %c0_75], %73 {strides = array<i32>} : memref<8x80xf32, #tpu.memory_space<vmem>>, vector<6x80xf32>,
    %c0_76 = arith.constant 0 : index
    %c0_77 = arith.constant 0 : index
    %75 = tpu.strided_load %arg16[%c0_76, %c0_77] {strides = array<i32: 8, 1>} : memref<8x80xf32, #tpu.memory_space<vmem>>, vector<1x80xf32>
    %76 = arith.truncf %75 : vector<1x80xf32> to vector<1x80xbf16>
    %c0_78 = arith.constant 0 : index
    %c0_79 = arith.constant 0 : index
    %c0_80 = arith.constant 0 : index
    %77 = vector.load %arg6[%c0_78, %c0_79, %c0_80] : memref<5x80x120xbf16, #tpu.memory_space<vmem>>, vector<1x80x120xbf16>
    %78 = vector.shape_cast %77 : vector<1x80x120xbf16> to vector<80x120xbf16>
    %cst_81 = arith.constant dense<0.000000e+00> : vector<1x120xf32>
    %79 = tpu.matmul %76, %78, %cst_81 {dimension_numbers = #tpu.dot_dimension_numbers<[1], [0], [0], [1], [0, 0, 1, 1], [], []>} : vector<1x80xbf16>, vector<80x120xbf16>, vector<1x120xf32> -> vector<1x120xf32>
    %c1_82 = arith.constant 1 : index
    %c0_83 = arith.constant 0 : index
    %80 = tpu.strided_load %arg16[%c1_82, %c0_83] {strides = array<i32: 8, 1>} : memref<8x80xf32, #tpu.memory_space<vmem>>, vector<1x80xf32>
    %81 = arith.truncf %80 : vector<1x80xf32> to vector<1x80xbf16>
    %c1_84 = arith.constant 1 : index
    %c0_85 = arith.constant 0 : index
    %c0_86 = arith.constant 0 : index
    %82 = vector.load %arg6[%c1_84, %c0_85, %c0_86] : memref<5x80x120xbf16, #tpu.memory_space<vmem>>, vector<1x80x120xbf16>
    %83 = vector.shape_cast %82 : vector<1x80x120xbf16> to vector<80x120xbf16>
    %cst_87 = arith.constant dense<0.000000e+00> : vector<1x120xf32>
    %84 = tpu.matmul %81, %83, %cst_87 {dimension_numbers = #tpu.dot_dimension_numbers<[1], [0], [0], [1], [0, 0, 1, 1], [], []>} : vector<1x80xbf16>, vector<80x120xbf16>, vector<1x120xf32> -> vector<1x120xf32>
    %85 = arith.addf %79, %84 : vector<1x120xf32>
    %c2_88 = arith.constant 2 : index
    %c0_89 = arith.constant 0 : index
    %86 = tpu.strided_load %arg16[%c2_88, %c0_89] {strides = array<i32: 8, 1>} : memref<8x80xf32, #tpu.memory_space<vmem>>, vector<1x80xf32>
    %87 = arith.truncf %86 : vector<1x80xf32> to vector<1x80xbf16>
    %c2_90 = arith.constant 2 : index
    %c0_91 = arith.constant 0 : index
    %c0_92 = arith.constant 0 : index
    %88 = vector.load %arg6[%c2_90, %c0_91, %c0_92] : memref<5x80x120xbf16, #tpu.memory_space<vmem>>, vector<1x80x120xbf16>
    %89 = vector.shape_cast %88 : vector<1x80x120xbf16> to vector<80x120xbf16>
    %cst_93 = arith.constant dense<0.000000e+00> : vector<1x120xf32>
    %90 = tpu.matmul %87, %89, %cst_93 {dimension_numbers = #tpu.dot_dimension_numbers<[1], [0], [0], [1], [0, 0, 1, 1], [], []>} : vector<1x80xbf16>, vector<80x120xbf16>, vector<1x120xf32> -> vector<1x120xf32>
    %91 = arith.addf %85, %90 : vector<1x120xf32>
    %c3_94 = arith.constant 3 : index
    %c0_95 = arith.constant 0 : index
    %92 = tpu.strided_load %arg16[%c3_94, %c0_95] {strides = array<i32: 8, 1>} : memref<8x80xf32, #tpu.memory_space<vmem>>, vector<1x80xf32>
    %93 = arith.truncf %92 : vector<1x80xf32> to vector<1x80xbf16>
    %c3_96 = arith.constant 3 : index
    %c0_97 = arith.constant 0 : index
    %c0_98 = arith.constant 0 : index
    %94 = vector.load %arg6[%c3_96, %c0_97, %c0_98] : memref<5x80x120xbf16, #tpu.memory_space<vmem>>, vector<1x80x120xbf16>
    %95 = vector.shape_cast %94 : vector<1x80x120xbf16> to vector<80x120xbf16>
    %cst_99 = arith.constant dense<0.000000e+00> : vector<1x120xf32>
    %96 = tpu.matmul %93, %95, %cst_99 {dimension_numbers = #tpu.dot_dimension_numbers<[1], [0], [0], [1], [0, 0, 1, 1], [], []>} : vector<1x80xbf16>, vector<80x120xbf16>, vector<1x120xf32> -> vector<1x120xf32>
    %97 = arith.addf %91, %96 : vector<1x120xf32>
    %c4_100 = arith.constant 4 : index
    %c0_101 = arith.constant 0 : index
    %98 = tpu.strided_load %arg16[%c4_100, %c0_101] {strides = array<i32: 8, 1>} : memref<8x80xf32, #tpu.memory_space<vmem>>, vector<1x80xf32>
    %99 = arith.truncf %98 : vector<1x80xf32> to vector<1x80xbf16>
    %c4_102 = arith.constant 4 : index
    %c0_103 = arith.constant 0 : index
    %c0_104 = arith.constant 0 : index
    %100 = vector.load %arg6[%c4_102, %c0_103, %c0_104] : memref<5x80x120xbf16, #tpu.memory_space<vmem>>, vector<1x80x120xbf16>
    %101 = vector.shape_cast %100 : vector<1x80x120xbf16> to vector<80x120xbf16>
    %cst_105 = arith.constant dense<0.000000e+00> : vector<1x120xf32>
    %102 = tpu.matmul %99, %101, %cst_105 {dimension_numbers = #tpu.dot_dimension_numbers<[1], [0], [0], [1], [0, 0, 1, 1], [], []>} : vector<1x80xbf16>, vector<80x120xbf16>, vector<1x120xf32> -> vector<1x120xf32>
    %103 = arith.addf %97, %102 : vector<1x120xf32>
    %c0_106 = arith.constant 0 : index
    %c0_107 = arith.constant 0 : index
    %104 = vector.load %arg7[%c0_106, %c0_107] : memref<1x120xf32, #tpu.memory_space<vmem>>, vector<1x120xf32>
    %105 = arith.addf %103, %104 : vector<1x120xf32>
    %cst_108 = arith.constant 0.000000e+00 : f32
    %106 = vector.broadcast %cst_108 : f32 to vector<1x120xf32>
    %107 = arith.maximumf %105, %106 : vector<1x120xf32>
    %108 = arith.truncf %107 : vector<1x120xf32> to vector<1x120xbf16>
    %c0_109 = arith.constant 0 : index
    %c0_110 = arith.constant 0 : index
    %109 = vector.load %arg8[%c0_109, %c0_110] : memref<120x84xbf16, #tpu.memory_space<vmem>>, vector<120x84xbf16>
    %cst_111 = arith.constant dense<0.000000e+00> : vector<1x84xf32>
    %110 = tpu.matmul %108, %109, %cst_111 {dimension_numbers = #tpu.dot_dimension_numbers<[1], [0], [0], [1], [0, 0, 1, 1], [], []>} : vector<1x120xbf16>, vector<120x84xbf16>, vector<1x84xf32> -> vector<1x84xf32>
    %c0_112 = arith.constant 0 : index
    %c0_113 = arith.constant 0 : index
    %111 = vector.load %arg9[%c0_112, %c0_113] : memref<1x84xf32, #tpu.memory_space<vmem>>, vector<1x84xf32>
    %112 = arith.addf %110, %111 : vector<1x84xf32>
    %cst_114 = arith.constant 0.000000e+00 : f32
    %113 = vector.broadcast %cst_114 : f32 to vector<1x84xf32>
    %114 = arith.maximumf %112, %113 : vector<1x84xf32>
    %115 = arith.truncf %114 : vector<1x84xf32> to vector<1x84xbf16>
    %c0_115 = arith.constant 0 : index
    %c0_116 = arith.constant 0 : index
    %116 = vector.load %arg10[%c0_115, %c0_116] : memref<84x10xbf16, #tpu.memory_space<vmem>>, vector<84x10xbf16>
    %cst_117 = arith.constant dense<0.000000e+00> : vector<1x10xf32>
    %117 = tpu.matmul %115, %116, %cst_117 {dimension_numbers = #tpu.dot_dimension_numbers<[1], [0], [0], [1], [0, 0, 1, 1], [], []>} : vector<1x84xbf16>, vector<84x10xbf16>, vector<1x10xf32> -> vector<1x10xf32>
    %c0_118 = arith.constant 0 : index
    %c0_119 = arith.constant 0 : index
    %118 = vector.load %arg11[%c0_118, %c0_119] : memref<1x10xf32, #tpu.memory_space<vmem>>, vector<1x10xf32>
    %119 = arith.addf %117, %118 : vector<1x10xf32>
    %c0_120 = arith.constant 0 : index
    %c0_121 = arith.constant 0 : index
    %c0_122 = arith.constant 0 : index
    %120 = vector.load %arg12[%c0_120, %c0_121, %c0_122] : memref<1x1x10xf32, #tpu.memory_space<vmem>>, vector<1x1x10xf32>
    %121 = vector.shape_cast %120 : vector<1x1x10xf32> to vector<1x10xf32>
    %122 = vector.shape_cast %119 : vector<1x10xf32> to vector<1x1x10xf32>
    tpu.vector_store %arg12[%c0_120, %c0_121, %c0_122], %122 {strides = array<i32>} : memref<1x1x10xf32, #tpu.memory_space<vmem>>, vector<1x1x10xf32>,
    return
  }
  func.func @transform_0(%arg0: i32) -> (i32, i32) {
    %c0_i32 = arith.constant 0 : i32
    %c0_i32_0 = arith.constant 0 : i32
    return %arg0, %c0_i32 : i32, i32
  }
  func.func @transform_1(%arg0: i32) -> (i32, i32, i32) {
    %c0_i32 = arith.constant 0 : i32
    %c0_i32_0 = arith.constant 0 : i32
    %c0_i32_1 = arith.constant 0 : i32
    %c0_i32_2 = arith.constant 0 : i32
    return %c0_i32, %c0_i32_0, %c0_i32_1 : i32, i32, i32
  }
  func.func @transform_2(%arg0: i32) -> (i32, i32) {
    %c0_i32 = arith.constant 0 : i32
    %c0_i32_0 = arith.constant 0 : i32
    %c0_i32_1 = arith.constant 0 : i32
    return %c0_i32, %c0_i32_0 : i32, i32
  }
  func.func @transform_3(%arg0: i32) -> (i32, i32, i32) {
    %c0_i32 = arith.constant 0 : i32
    %c0_i32_0 = arith.constant 0 : i32
    %c0_i32_1 = arith.constant 0 : i32
    %c0_i32_2 = arith.constant 0 : i32
    return %c0_i32, %c0_i32_0, %c0_i32_1 : i32, i32, i32
  }
  func.func @transform_4(%arg0: i32) -> (i32, i32) {
    %c0_i32 = arith.constant 0 : i32
    %c0_i32_0 = arith.constant 0 : i32
    %c0_i32_1 = arith.constant 0 : i32
    return %c0_i32, %c0_i32_0 : i32, i32
  }
  func.func @transform_5(%arg0: i32) -> (i32, i32, i32) {
    %c0_i32 = arith.constant 0 : i32
    %c0_i32_0 = arith.constant 0 : i32
    %c0_i32_1 = arith.constant 0 : i32
    %c0_i32_2 = arith.constant 0 : i32
    return %c0_i32, %c0_i32_0, %c0_i32_1 : i32, i32, i32
  }
  func.func @transform_6(%arg0: i32) -> (i32, i32) {
    %c0_i32 = arith.constant 0 : i32
    %c0_i32_0 = arith.constant 0 : i32
    %c0_i32_1 = arith.constant 0 : i32
    return %c0_i32, %c0_i32_0 : i32, i32
  }
  func.func @transform_7(%arg0: i32) -> (i32, i32) {
    %c0_i32 = arith.constant 0 : i32
    %c0_i32_0 = arith.constant 0 : i32
    %c0_i32_1 = arith.constant 0 : i32
    return %c0_i32, %c0_i32_0 : i32, i32
  }
  func.func @transform_8(%arg0: i32) -> (i32, i32) {
    %c0_i32 = arith.constant 0 : i32
    %c0_i32_0 = arith.constant 0 : i32
    %c0_i32_1 = arith.constant 0 : i32
    return %c0_i32, %c0_i32_0 : i32, i32
  }
  func.func @transform_9(%arg0: i32) -> (i32, i32) {
    %c0_i32 = arith.constant 0 : i32
    %c0_i32_0 = arith.constant 0 : i32
    %c0_i32_1 = arith.constant 0 : i32
    return %c0_i32, %c0_i32_0 : i32, i32
  }
  func.func @transform_10(%arg0: i32) -> (i32, i32) {
    %c0_i32 = arith.constant 0 : i32
    %c0_i32_0 = arith.constant 0 : i32
    %c0_i32_1 = arith.constant 0 : i32
    return %c0_i32, %c0_i32_0 : i32, i32
  }
  func.func @transform_11(%arg0: i32) -> (i32, i32, i32) {
    %c0_i32 = arith.constant 0 : i32
    %c0_i32_0 = arith.constant 0 : i32
    %c0_i32_1 = arith.constant 0 : i32
    return %arg0, %c0_i32, %c0_i32_0 : i32, i32, i32
  }
}

</mosaic_0001>

<bundles_post_ra>
// kernel: lenet5_forward.1
= control target key start
LH: loop header
LB: loop body
LE: loop exit
PB: predicated region body
PF: predicated region fallthrough
CT: control target
= control target key end

     0   :  { %16 = vsyncpa [#allocation7], 0  ;;  %s3606_s0 = inlined_call_operand.vmem [shape: bf16[64,32], index: 0, kind: input, shape index: {}]   ;;  %s3607_s1 = inlined_call_operand.hbm [shape: bf16[5,32,212], index: 1, kind: input, shape index: {}]   ;;  %s3608_s2 = inlined_call_operand.vmem [shape: f32[1,84], index: 2, kind: input, shape index: {}]   ;;  %s3609_s3 = inlined_call_operand.hbm [shape: bf16[5,84,208], index: 3, kind: input, shape index: {}]   ;;  %s3610_s4 = inlined_call_operand.vmem [shape: f32[1,80], index: 4, kind: input, shape index: {}]   ;;  %s3611_s5 = inlined_call_operand.vmem [shape: bf16[5,80,120], index: 5, kind: input, shape index: {}]   ;;  %s3612_s6 = inlined_call_operand.vmem [shape: f32[1,120], index: 6, kind: input, shape index: {}]   ;;  %s3613_s7 = inlined_call_operand.vmem [shape: bf16[120,84], index: 7, kind: input, shape index: {}]   ;;  %s3614_s8 = inlined_call_operand.vmem [shape: f32[1,84], index: 8, kind: input, shape index: {}]   ;;  %s3615_s9 = inlined_call_operand.vmem [shape: bf16[84,10], index: 9, kind: input, shape index: {}]   ;;  %s3616_s10 = inlined_call_operand.vmem [shape: f32[1,10], index: 10, kind: input, shape index: {}]   ;;  %s3617_s11 = inlined_call_operand.hbm [shape: f32[2,1,10], index: 11, kind: output, shape index: {}]  }
   0x1   :  { %17 = vsyncpa [#allocation10], 0 }
   0x2   :  { %18 = vsyncpa [#allocation8], 0 }
   0x3   :  { %20 = vsyncpa [#allocation8 + $0x1], 0  ;;  %s3179_s17 = smov 0   ;;  %s3181_s18 = smov 0  }
   0x4   :  { %s3183_s19 = smov 0   ;;  %s3185_s20 = smov 0  }
   0x5 LB: > { %3626 = sst [smem:[#allocation15_spill]] %s3097_s17  ;;  %s3200_s21 = sadd.s32 4294967295, %s3109_s20   ;;  %s3109_s20 = sphi %s3185_s20, %s3644_s20   ;;  %s3105_s19 = sphi %s3183_s19, %s3646_s19   ;;  %s3101_s18 = sphi %s3181_s18, %s3648_s18   ;;  %s3097_s17 = sphi %s3179_s17, %s3647_s17  }
   0x6   : > { %3627 = sst [smem:[#allocation16_spill]] %s3105_s19  ;;  %s2351_s22 = sadd.s32 4294967294, %s3109_s20  }
   0x7   : > { %s3204_s23 = sadd.s32 1, %s3109_s20   ;;  %s269_s24 = sadd.s32 1, %s3105_s19 }
   0x8   : > { %3628 = sst [smem:[#allocation17_spill]] %s3204_s23  ;;  %s266_s25 = ssub.s32 %s3109_s20, %s3204_s23 }
   0x9   : > { %p279_p0 = scmp.ne.s32.totalorder %s3105_s19, %s3101_s18  ;;  %p267_p1 = scmp.eq.s32.totalorder %s266_s25, 0 }
   0xa   : > { %p280_p2 = scmp.eq.s32.totalorder %s3200_s21, 1  ;;  %p285_p3 = scmp.ne.s32.totalorder %s3101_s18, %s3097_s17 }
   0xb   : > { %p286_p4 = scmp.eq.s32.totalorder %s2351_s22, 1  ;;  %p2352_p7 = scmp.ge.s32.totalorder %s3109_s20, 1 }
   0xc   : > { %s3215_s26 = scalar_select %p267_p1, %s3105_s19, %s269_s24  }
   0xd   : > { %p3217_p5 = por %p280_p2, %p279_p0  ;;  %p3221_p6 = por %p286_p4, %p285_p3 }
   0xe   : > { %3629 = sst [smem:[#allocation18_spill]] %s3215_s26  ;;  %p293_p8 = scmp.lt.s32.totalorder %s3109_s20, 3 }
   0xf   : > { %s3630_s27 = scalar_select %p3217_p5, 1, 0 }
  0x10   : > { %s3631_s28 = scalar_select %p3221_p6, 1, 0 }
  0x11   : > { %p3619_p9 = scmp.eq.s32.totalorder %s3200_s21, 0  ;;  %p3228_p10 = pnand %p2352_p7, %p293_p8 }
  0x12   : > { %3632 = sst [smem:[#allocation19_spill]] %s3631_s28  ;;  %s3111_s30 = smov [#allocation6]  }
  0x13   : > { %s3633_s29 = scalar_select %p3228_p10, 1, 0 }
  0x14   : > { %s305_s12 = sshll.u32 %s3111_s30, 4  ;;  %p2768_p11 = pneg %p3228_p10  ;;  %s306_s12 = int_to_ptr.vmem [resolvable:$true] %s305_s12 }
  0x15   : > { %s3112_s14 = smov [#allocation9]   ;;  %s2983_s24 = scalar_lea.hbm %s3607_s1, 2560 }
  0x16   : > { %p3236_p12 = pnand %p3619_p9, %p2768_p11  ;;  %s321_s15 = sshll.u32 %s3112_s14, 4  ;;  %s3240_s15 = int_to_ptr.vmem [resolvable:$true] %s321_s15 }
  0x17   : > { %p2984_p13 = scmp.ne.s32.totalorder %s3607_s1, %s2983_s24  ;;  %p2990_p3 = scmp.lt.u32.totalorder %s2983_s24, %s3607_s1 }
  0x18   : > { %p2985_p0 = pneg %p3236_p12 }
  0x1a   : > { %p2986_p1 = pnand %p2985_p0, %p2984_p13 }
  0x1c   : > { %p2987_p2 = pneg %p2986_p1 }
  0x1e   : > { %p2992_p4 = pnand %p2990_p3, %p2987_p2 }
  0x20   : > { %2995 = shalt.err (!%p2992_p4)
}
  0x21   : > { %s2996_s14 = scalar_lea.vmem %s306_s12, 2560  ;;  %p3004_p9 = scmp.lt.s32.totalorder %s306_s12, %s306_s12 }
  0x22   : > { %p2997_p7 = scmp.ne.s32.totalorder %s306_s12, %s2996_s14  ;;  %p3005_p6 = scmp.lt.s32.totalorder %s2996_s14, %s2996_s14 }
  0x24   : > { %p2999_p8 = pnand %p2997_p7, %p2985_p0  ;;  %p3006_p5 = por %p3005_p6, %p3004_p9 }
  0x26   : > { %p3000_p11 = pneg %p2999_p8 }
  0x28   : > { %p3007_p10 = pnand %p3006_p5, %p3000_p11 }
  0x2a   : > { %3010 = shalt.err (!%p3007_p10)
}
  0x2b   : > { %s3113_s16 = smov 128   ;;  %s3114_s22 = smov 8  }
  0x2c   : > { %2771 = dma.hbm_to_vmem [thread:$0]  (!%p3236_p12), %s3607_s1, 2560, %s306_s12, [#allocation7], %s3113_s16, %s3113_s16, %s3114_s22  }
  0x2d   : > { %s3011_s30 = scalar_lea.hbm %s3609_s3, 7040 }
  0x2e   : > { %p3012_p13 = scmp.ne.s32.totalorder %s3609_s3, %s3011_s30  ;;  %p3018_p9 = scmp.lt.u32.totalorder %s3011_s30, %s3609_s3 }
  0x30   : > { %p3014_p5 = pnand %p3012_p13, %p2985_p0 }
  0x32   : > { %p3015_p6 = pneg %p3014_p5 }
  0x34   : > { %p3020_p10 = pnand %p3018_p9, %p3015_p6 }
  0x36   : > { %3023 = shalt.err (!%p3020_p10)
}
  0x37   : > { %s3024_s12 = scalar_lea.vmem %s3240_s15, 7040  ;;  %p3032_p4 = scmp.lt.s32.totalorder %s3240_s15, %s3240_s15 }
  0x38   : > { %p3025_p1 = scmp.ne.s32.totalorder %s3240_s15, %s3024_s12  ;;  %p3033_p7 = scmp.lt.s32.totalorder %s3024_s12, %s3024_s12 }
  0x3a   : > { %p3027_p2 = pnand %p3025_p1, %p2985_p0  ;;  %p3034_p8 = por %p3033_p7, %p3032_p4 }
  0x3c   : > { %p3028_p3 = pneg %p3027_p2 }
  0x3e   : > { %p3035_p11 = pnand %p3034_p8, %p3028_p3 }
  0x40   : > { %3038 = shalt.err (!%p3035_p11)
}
  0x41   : > { %2774 = dma.hbm_to_vmem [thread:$0]  (!%p3236_p12), %s3609_s3, 7040, %s3240_s15, [#allocation10], %s3113_s16, %s3113_s16, %s3114_s22  }
  0x42   : > { %p3635_p13 = scmp.ne.s32.totalorder %s3633_s29, 0 }
  0x43   : > { %p3636_p5 = scmp.eq.s32.totalorder (!%p3635_p13), %s3200_s21, 0 }
  0x44   : > { %367 = sbr.rel (%p3635_p13) target bundleno = 1478 (0x5c6), region = 64 }
  0x4b   : > { %3084 = dma.done.wait (%p3636_p5), [#allocation7], 2560   ;;  %p3637_p0 = pmov %p3636_p5 }
  0x4d   : > { %3086 = vsyncadd (%p3637_p0), [#allocation7], 4294964736  ;;  %p3638_p6 = pmov %p3637_p0 }
  0x4e   : > { %p3639_p9 = pmov %p3637_p0 }
  0x4f   : > { %3088 = dma.done.wait (%p3638_p6), [#allocation10], 7040  }
  0x50   : > { %3090 = vsyncadd (%p3639_p9), [#allocation10], 4294960256  ;;  %s2359_s28 = sshll.u32 %s3200_s21, 2  ;;  %v3115_v0 = vmov 0   ;;  %v2823_v1 = vld [vmem:[#allocation6 + $0x24] ss:$8 sps:$4 sm:$0xff]  }
  0x51   : > { %516 = vmatprep.mubr.bf16.mxu0 %v3115_v0  ;;  %p411_p12 = scmp.lt.s32.totalorder %s2359_s28, 7  ;;  %1094 = vmatprep.mubr.bf16.mxu1 %v3115_v0  ;;  %v2825_v2 = vld [vmem:[#allocation6 + $0x20] ss:$8 sps:$4 sm:$0xff]   ;;  %v2826_v3 = vld [vmem:[#allocation6 + $0x34] ss:$8 sps:$4 sm:$0xff]   ;;  %vm477_vm1 = vcmask 261120  }
  0x52   : > { %484 = vmatprep.subr.bf16.mxu0 %v2823_v1  ;;  %v2828_v4 = vld [vmem:[#allocation6 + $0x30] ss:$8 sps:$4 sm:$0xff]   ;;  %v2834_v11 = vld [vmem:[#allocation6 + $0x4] ss:$8 sps:$4 sm:$0xff]   ;;  %vm441_vm0 = vsmask.f32 7424 }
  0x53   : > { %s3650_s28 = smov (!%p411_p12, %s2359_s28), 7  ;;  %485 = vmatpush1.bf16.msra.mxu0 %v2825_v2  ;;  %v2832_v18 = vld [vmem:[#allocation6] ss:$8 sps:$4 sm:$0xff]   ;;  %v2837_v19 = vld [vmem:[#allocation6 + $0x14] ss:$8 sps:$4 sm:$0xff]   ;;  %vm627_vm2 = vcmask 1046528  }
  0x54   : > { %s2360_s29 = sshll.u32 %s3650_s28, 2  ;;  %486 = vmatprep.subr.bf16.mxu0 %v2826_v3  ;;  %v2835_v22 = vld [vmem:[#allocation6 + $0x10] ss:$8 sps:$4 sm:$0xff]   ;;  %v2840_v23 = vld [vmem:[#allocation6 + $0x44] ss:$8 sps:$4 sm:$0xff]   ;;  %vm841_vm4 = vcmask 1045504  }
  0x55   : > { %s3305_s16 = scalar_lea.vmem %s3606_s0, %s2360_s29  ;;  %v2838_v30 = vld [vmem:[#allocation6 + $0x40] ss:$8 sps:$4 sm:$0xff]   ;;  %v2844_v31 = vld [vmem:[#allocation6 + $0x54] ss:$8 sps:$4 sm:$0xff]   ;;  %v2842_v34 = vld [vmem:[#allocation6 + $0x50] ss:$8 sps:$4 sm:$0xff]  }
  0x56   : > { %v417_v5 = vld [vmem:[%s3305_s16] sm:$0xf]  ;;  %v3309_v6 = vld [vmem:[%s3305_s16 + $0x4] sm:$0xf]  ;;  %v419_v7 = vld [vmem:[%s3305_s16 + $0x8] sm:$0xf] }
  0x57   : > { %v425_v8 = vld [vmem:[%s3305_s16 + $0xc] sm:$0x7]  ;;  %v2361_v9 = vcombine.low %v417_v5, %v3309_v6  ;;  %487 = vmatpush1.bf16.msra.mxu0 %v2828_v4  ;;  %v832_v25 = vld [vmem:[%s3305_s16] sm:$0xc]  ;;  %v2846_v47 = vld [vmem:[#allocation6 + $0x60] ss:$8 sps:$4 sm:$0xff]  }
  0x58   : > { %v3314_v10 = vcombine.low %v419_v7, %v425_v8  ;;  %565 = vmatprep.subr.bf16.mxu0 %v2834_v11  ;;  %v2390_v26 = vcombine.low %v832_v25, %v3309_v6  ;;  %v718_v27 = vld [vmem:[%s3305_s16 + $0xc] sm:$0xf]  ;;  %v618_v28 = vld [vmem:[%s3305_s16] sm:$0xe]  ;;  %v2851_v48 = vld [vmem:[#allocation6 + $0x74] ss:$8 sps:$4 sm:$0xff]  }
  0x59   : > { %v443_v12 = vshrl.u32 %v2361_v9, 16  ;;  %v445_v13 = vshll.u32 %v2361_v9, 16  ;;  %v2383_v29 = vcombine.low %v419_v7, %v718_v27  ;;  %v2376_v32 = vcombine.low %v618_v28, %v3309_v6  ;;  %v420_v33 = vld [vmem:[%s3305_s16 + $0xc] sm:$0x3]  ;;  %v2849_v50 = vld [vmem:[#allocation6 + $0x70] ss:$8 sps:$4 sm:$0xff]  }
  0x5a   : > { %v450_v14 = vshll.u32 %v3314_v10, 16  ;;  %v454_v21 = vshrl.u32 %v3314_v10, 16  ;;  %v2848_v37 = vld [vmem:[#allocation6 + $0x64] ss:$8 sps:$4 sm:$0xff]   ;;  %v629_v40 = vrot.slane %v3314_v10, 1  ;;  %v2369_v44 = vcombine.low %v419_v7, %v420_v33  ;;  %s408_s29 = sand.u32 1, %s3101_s18  }
  0x5b   : > { %v447_v15 = vrot.slane %v445_v13, 1  ;;  %v737_v35 = vshrl.u32 %v2383_v29, 16  ;;  %v740_v36 = vshll.u32 %v2383_v29, 16  ;;  %v729_v38 = vshrl.u32 %v2376_v32, 16  ;;  %v2854_v51 = vld [vmem:[#allocation6 + $0x84] ss:$8 sps:$4 sm:$0xff]  }
  0x5c   : > { %v452_v16 = vrot.slane %v450_v14, 1  ;;  %v732_v39 = vshll.u32 %v2376_v32, 16  ;;  %v628_v41 = vrot.slane %v2376_v32, 1  ;;  %vm727_vm3 = vsmask.f32 6400  ;;  %s2555_s16 = sshll.u32 %s3200_s21, 4 }
  0x5d   : > { %v448_v17 = vor.u32 %v447_v15, %v443_v12  ;;  %v739_v42 = vrot.slane %v737_v35, 1  ;;  %v742_v43 = vrot.slane %v740_v36, 2  ;;  %v731_v45 = vrot.slane %v729_v38, 1  ;;  %v2852_v54 = vld [vmem:[#allocation6 + $0x80] ss:$8 sps:$4 sm:$0xff]   ;;  %s409_s22 = scalar_lea.vmem [#allocation11], %s408_s29  ;;  %s3564_s25 = scalar_lea.hbm %s3617_s11, %s2555_s16 }
  0x5e   : > { %v456_v24 = vor.u32 %v454_v21, %v452_v16  ;;  %v734_v46 = vrot.slane %v732_v39, 2  ;;  %v630_v49 = vsel %vm627_vm2, %v628_v41, %v629_v40  ;;  %v2857_v56 = vld [vmem:[#allocation6 + $0x94] ss:$8 sps:$4 sm:$0xff]   ;;  %v2855_v57 = vld [vmem:[#allocation6 + $0x90] ss:$8 sps:$4 sm:$0xff]   ;;  %v842_v58 = vrot.slane %v2390_v26, 2 }
  0x5f   : > { %v453_v20 = vsel %vm441_vm0, %v448_v17, %v452_v16  ;;  %v743_v53 = vor.u32 %v742_v43, %v739_v42  ;;  %v843_v59 = vrot.slane %v2383_v29, 2  ;;  %v2859_v61 = vld [vmem:[#allocation9 + $0x5c] ss:$8 sps:$4 sm:$0xff]   ;;  %v2861_v62 = vld [vmem:[#allocation9 + $0x58] ss:$8 sps:$4 sm:$0xff]   ;;  %vm1055_vm5 = vcmask 1041408  }
  0x60   : > { %2367 = vmatmul.mubr.msk.bf16.vlgmr.msra.gmra.mrb[0].mxu0 %vm477_vm1, %v453_v20  ;;  %v735_v52 = vor.u32 %v734_v46, %v731_v45  ;;  %1062 = vmatprep.subr.bf16.mxu1 %v2859_v61  ;;  %v2862_v63 = vld [vmem:[#allocation9 + $0x6c] ss:$8 sps:$4 sm:$0xff]   ;;  %v2864_v1 = vld [vmem:[#allocation9 + $0x68] ss:$8 sps:$4 sm:$0xff]   ;;  %v2865_v2 = vld [vmem:[#allocation9 + $0x7c] ss:$8 sps:$4 sm:$0xff]  }
  0x61   : > { %566 = vmatpush1.bf16.msra.mxu0 %v2832_v18  ;;  %526 = vmatprep.mubr.bf16.mxu0 %v3115_v0  ;;  %v844_v60 = vsel %vm841_vm4, %v842_v58, %v843_v59  ;;  %v2867_v3 = vld [vmem:[#allocation9 + $0x78] ss:$8 sps:$4 sm:$0xff]   ;;  %v2868_v4 = vld [vmem:[#allocation9 + $0x8c] ss:$8 sps:$4 sm:$0xff]   ;;  %v2870_v5 = vld [vmem:[#allocation9 + $0x88] ss:$8 sps:$4 sm:$0xff]  }
  0x62   : > { %567 = vmatprep.subr.bf16.mxu0 %v2837_v19  ;;  %v744_v55 = vsel %vm727_vm3, %v735_v52, %v743_v53  ;;  %1063 = vmatpush1.bf16.msra.mxu1 %v2861_v62  ;;  %v2871_v6 = vld [vmem:[#allocation9 + $0x9c] ss:$8 sps:$4 sm:$0xff]   ;;  %v989_v7 = vld [vmem:[#allocation9 + $0xa8] sm:$0x33]  ;;  %v2873_v8 = vld [vmem:[#allocation9 + $0x98] ss:$8 sps:$4 sm:$0xff]  }
  0x63   : > { %1064 = vmatprep.subr.bf16.mxu1 %v2862_v63  ;;  %v2408_v10 = vcombine.low %v989_v7, %v989_v7  ;;  %v2878_v12 = vld [vmem:[#allocation9 + $0x4] ss:$8 sps:$4 sm:$0xff]   ;;  %vm936_vm6 = vcmask 687104   ;;  %vm940_vm7 = vcmask 683008   ;;  %v2397_v28 = vld [vmem:[%s3608_s2] ss:$0 sm:$0xff] }
  0x64   : > { %vm963_vm8 = vcmask 686080   ;;  %v2876_v41 = vld [vmem:[#allocation9] ss:$8 sps:$4 sm:$0xff]   ;;  %v2881_v43 = vld [vmem:[#allocation9 + $0x14] ss:$8 sps:$4 sm:$0xff]   ;;  %vm3117_vm9 = vmmov 0  }
  0x65   : > { %568 = vmatpush1.bf16.msra.mxu0 %v2835_v22  ;;  %v1057_v11 = vsel %vm1055_vm5, %v2408_v10, 0  ;;  %v2884_v45 = vld [vmem:[#allocation9 + $0x24] ss:$8 sps:$4 sm:$0xff]   ;;  %v2882_v46 = vld [vmem:[#allocation9 + $0x20] ss:$8 sps:$4 sm:$0xff]   ;;  %vm1598_vm10 = vcmask 654336  }
  0x66   : > { %657 = vmatprep.subr.bf16.mxu0 %v2840_v23  ;;  %1065 = vmatpush1.bf16.msra.mxu1 %v2864_v1  ;;  %v2899_v61 = vld [vmem:[#allocation9 + $0xd0] ss:$8 sps:$4 sm:$0xff]   ;;  %v2904_v62 = vld [vmem:[#allocation9 + $0xe4] ss:$8 sps:$4 sm:$0xff]   ;;  %v2902_v63 = vld [vmem:[#allocation9 + $0xe0] ss:$8 sps:$4 sm:$0xff]  }
  0x67   : > { %1066 = vmatprep.subr.bf16.mxu1 %v2865_v2  ;;  %v2907_v1 = vld [vmem:[#allocation9 + $0xf4] ss:$8 sps:$4 sm:$0xff]   ;;  %v1224_v2 = vld [vmem:[#allocation9 + $0x100] sm:$0x33]  ;;  %vm1600_vm11 = vcmask 650240   ;;  %vm1615_vm12 = vcmask 652288  }
  0x68   : > { %2368 = vmatmul.mubr.msk.bf16.gmra.mrb[4].mxu0 %vm477_vm1, %v456_v24  ;;  %vm2122_vm13 = vcmask 1043456   ;;  %vm2118_vm14 = vcmask 982016   ;;  %s2274_s19 = sshll.u32 %s409_s22, 4  ;;  %vm2259_vm15 = vcmask 73728   ;;  %s2262_s21 = scalar_lea.sflag [#allocation8], %s408_s29  ;;  %s3566_s19 = int_to_ptr.vmem [resolvable:$true] %s2274_s19 }
  0x69   : > { %597 = vmatprep.mubr.bf16.mxu0 %v3115_v0  ;;  %s3039_s30 = scalar_lea.vmem %s3566_s19, 16  ;;  %p3640_p1 = scmp.ne.s32.totalorder %s3630_s27, 0 }
  0x6a   : > { %1067 = vmatpush1.bf16.msra.mxu1 %v2867_v3  ;;  %v2905_v3 = vld [vmem:[#allocation9 + $0xf0] ss:$8 sps:$4 sm:$0xff]   ;;  %p3040_p10 = scmp.ne.s32.totalorder %s3566_s19, %s3039_s30  ;;  %s3118_s14 = smov [#allocation11]  }
  0x6b   : > { %1068 = vmatprep.subr.bf16.mxu1 %v2868_v4  ;;  %v2437_v4 = vcombine.high %v1224_v2, %v1224_v2  ;;  %s3043_s12 = sshll.u32 %s3118_s14, 4  ;;  %s3044_s12 = int_to_ptr.vmem [resolvable:$false] %s3043_s12 }
  0x6c   : > { %p3041_p2 = pnand %p3040_p10, %p3640_p1  ;;  %s3045_s17 = scalar_lea.vmem %s3044_s12, 32 }
  0x6d   : > { %p3046_p4 = scmp.lt.s32.totalorder %s3566_s19, %s3044_s12  ;;  %p3047_p7 = scmp.lt.s32.totalorder %s3045_s17, %s3039_s30 }
  0x6e   : > { %1069 = vmatpush1.bf16.msra.mxu1 %v2870_v5  ;;  %v2436_v5 = vcombine.low %v1224_v2, %v1224_v2  ;;  %p3042_p3 = pneg %p3041_p2 }
  0x6f   : > { %1070 = vmatprep.subr.bf16.mxu1 %v2871_v6  ;;  %p3048_p8 = por %p3047_p7, %p3046_p4 }
  0x70   : > { %2374 = vmatmul.mubr.msk.bf16.vlgmr.msra.gmra.mrb[0].mxu0 %vm477_vm1, %v2361_v9  ;;  %v2409_v9 = vcombine.high %v989_v7, %v989_v7  ;;  %v1286_v6 = vsel %vm1055_vm5, %v2436_v5, 0  ;;  %v2912_v7 = vld [vmem:[#allocation9 + $0x10c] ss:$8 sps:$4 sm:$0xff]  }
  0x71   : > { %658 = vmatpush1.bf16.msra.mxu0 %v2838_v30  ;;  %607 = vmatprep.mubr.bf16.mxu0 %v3115_v0  ;;  %p3049_p11 = pnand %p3048_p8, %p3042_p3 }
  0x72   : > { %659 = vmatprep.subr.bf16.mxu0 %v2844_v31  ;;  %1071 = vmatpush1.bf16.msra.mxu1 %v2873_v8 }
  0x73   : > { %2410 = vmatprep.subr.msk.bf16.mxu1 %vm1055_vm5, %v2409_v9  ;;  %v2910_v9 = vld [vmem:[#allocation9 + $0x108] ss:$8 sps:$4 sm:$0xff]  }
  0x75   : > { %660 = vmatpush1.bf16.msra.mxu0 %v2842_v34 }
  0x76   : > { %771 = vmatprep.subr.bf16.mxu0 %v2848_v37  ;;  %1073 = vmatpush1.bf16.msra.mxu1 %v1057_v11  ;;  %v2915_v11 = vld [vmem:[#allocation9 + $0x11c] ss:$8 sps:$4 sm:$0xff]  }
  0x77   : > { %1169 = vmatprep.subr.bf16.mxu1 %v2878_v12  ;;  %v2913_v12 = vld [vmem:[#allocation9 + $0x118] ss:$8 sps:$4 sm:$0xff]  }
  0x78   : > { %2375 = vmatmul.mubr.msk.bf16.gmra.mrb[4].mxu0 %vm477_vm1, %v2369_v44  ;;  %v2879_v44 = vld [vmem:[#allocation9 + $0x10] ss:$8 sps:$4 sm:$0xff]  }
  0x79   : > { %689 = vmatprep.mubr.bf16.mxu0 %v3115_v0 }
  0x80   : > { %2381 = vmatmul.mubr.msk.bf16.vlgmr.msra.gmra.mrb[0].mxu0 %vm477_vm1, %v630_v49  ;;  %v2890_v49 = vld [vmem:[#allocation9 + $0x44] ss:$8 sps:$4 sm:$0xff]  }
  0x81   : > { %772 = vmatpush1.bf16.msra.mxu0 %v2846_v47  ;;  %699 = vmatprep.mubr.bf16.mxu0 %v3115_v0  ;;  %v2887_v47 = vld [vmem:[#allocation9 + $0x34] ss:$8 sps:$4 sm:$0xff]  }
  0x82   : > { %773 = vmatprep.subr.bf16.mxu0 %v2851_v48  ;;  %v2885_v48 = vld [vmem:[#allocation9 + $0x30] ss:$8 sps:$4 sm:$0xff]  }
  0x85   : > { %774 = vmatpush1.bf16.msra.mxu0 %v2849_v50  ;;  %v976_v50 = vld [vmem:[#allocation9 + $0x50] sm:$0x33] }
  0x86   : > { %871 = vmatprep.subr.bf16.mxu0 %v2854_v51  ;;  %v2888_v51 = vld [vmem:[#allocation9 + $0x40] ss:$8 sps:$4 sm:$0xff]   ;;  %v2423_v52 = vcombine.high %v976_v50, %v976_v50 }
  0x88   : > { %2382 = vmatmul.mubr.msk.bf16.gmra.mrb[4].mxu0 %vm477_vm1, %v629_v40 }
  0x89   : > { %803 = vmatprep.mubr.bf16.mxu0 %v3115_v0 }
  0x90   : > { %2388 = vmatmul.mubr.msk.bf16.vlgmr.msra.gmra.mrb[0].mxu0 %vm477_vm1, %v744_v55  ;;  %v2895_v55 = vld [vmem:[#allocation9 + $0xb4] ss:$8 sps:$4 sm:$0xff]  }
  0x91   : > { %872 = vmatpush1.bf16.msra.mxu0 %v2852_v54  ;;  %813 = vmatprep.mubr.bf16.mxu0 %v3115_v0 }
  0x92   : > { %873 = vmatprep.subr.bf16.mxu0 %v2857_v56  ;;  %v2893_v56 = vld [vmem:[#allocation9 + $0xb0] ss:$8 sps:$4 sm:$0xff]  }
  0x95   : > { %874 = vmatpush1.bf16.msra.mxu0 %v2855_v57  ;;  %v2898_v57 = vld [vmem:[#allocation9 + $0xc4] ss:$8 sps:$4 sm:$0xff]  }
  0x98   : > { %2389 = vmatmul.mubr.msk.bf16.gmra.mrb[4].mxu0 %vm477_vm1, %v743_v53  ;;  %v2422_v53 = vcombine.low %v976_v50, %v976_v50  ;;  %v2949_v50 = vld [vmem:[%s3611_s5 + $0x88] sm:$0xff]  }
  0x99   : > { %903 = vmatprep.mubr.bf16.mxu0 %v3115_v0 }
  0x9a   : > { %v1164_v54 = vsel %vm1055_vm5, %v2422_v53, 0  ;;  %v2952_v53 = vld [vmem:[%s3611_s5 + $0x48] sm:$0xff]  }
  0xa0   : > { %2395 = vmatmul.mubr.msk.bf16.vlgmr.msra.gmra.mrb[0].mxu0 %vm477_vm1, %v844_v60  ;;  %v2901_v60 = vld [vmem:[#allocation9 + $0xd4] ss:$8 sps:$4 sm:$0xff]  }
  0xa1   : > { %913 = vmatprep.mubr.bf16.mxu0 %v3115_v0 }
  0xa8   : > { %2396 = vmatmul.mubr.msk.bf16.gmra.mrb[4].mxu0 %vm477_vm1, %v843_v59  ;;  %v2896_v59 = vld [vmem:[#allocation9 + $0xc0] ss:$8 sps:$4 sm:$0xff]  }
 0x173   : > { %v905_v13 = vpop.f32.mrb[0].mxu0 }
 0x174   : > { %v907_v14 = vpop.f32.mrb[1].mxu0 }
 0x175   : > { %v932_v15 = vmax.f32 %v905_v13, %v907_v14  ;;  %v909_v16 = vpop.f32.mrb[2].mxu0  ;;  %v2918_v13 = vld [vmem:[#allocation9 + $0x12c] ss:$8 sps:$4 sm:$0xff]   ;;  %v2916_v14 = vld [vmem:[#allocation9 + $0x128] ss:$8 sps:$4 sm:$0xff]  }
 0x176   : > { %v911_v17 = vpop.f32.mrb[3].mxu0 }
 0x177   : > { %937 = vst.msk [vmem:[#allocation2] sm:$0xff] %vm936_vm6, %v932_v15  ;;  %v933_v18 = vmax.f32 %v909_v16, %v911_v17  ;;  %v2921_v15 = vld [vmem:[#allocation9 + $0x13c] ss:$8 sps:$4 sm:$0xff]   ;;  %v2919_v16 = vld [vmem:[#allocation9 + $0x138] ss:$8 sps:$4 sm:$0xff]  }
 0x178   : > { %v2924_v17 = vld [vmem:[#allocation9 + $0x14c] ss:$8 sps:$4 sm:$0xff]  }
 0x179   : > { %938 = vst.msk [vmem:[#allocation2 + $0x8] sm:$0xff] %vm936_vm6, %v933_v18  ;;  %v1350_v18 = vld [vmem:[#allocation9 + $0x158] sm:$0x33] }
 0x17b   : > { %v915_v19 = vpop.f32.mrb[4].mxu0 }
 0x17c   : > { %v917_v20 = vpop.f32.mrb[5].mxu0 }
 0x17d   : > { %v934_v21 = vmax.f32 %v915_v19, %v917_v20  ;;  %v919_v22 = vpop.f32.mrb[6].mxu0  ;;  %v2922_v20 = vld [vmem:[#allocation9 + $0x148] ss:$8 sps:$4 sm:$0xff]  }
 0x17e   : > { %v921_v23 = vpop.f32.mrb[7].mxu0 }
 0x17f   : > { %939 = vst.msk [vmem:[#allocation2 + $0x10] sm:$0xff] %vm936_vm6, %v934_v21  ;;  %v935_v24 = vmax.f32 %v919_v22, %v921_v23  ;;  %v2451_v21 = vcombine.high %v1350_v18, %v1350_v18  ;;  %v2450_v22 = vcombine.low %v1350_v18, %v1350_v18  ;;  %v2962_v18 = vld [vmem:[%s3611_s5 + $0x68] sm:$0xff]  }
 0x180   : > { %v942_v25 = vld [vmem:[#allocation2] ss:$2 sm:$0xff]  ;;  %v946_v26 = vld [vmem:[#allocation2 + $0x1] ss:$2 sm:$0xff] }
 0x181   : > { %941 = vst.msk [vmem:[#allocation2 + $0x18] sm:$0xf] %vm940_vm7, %v935_v24  ;;  %v949_v27 = vmax.f32 %v942_v25, %v946_v26  ;;  %v1418_v25 = vsel %vm1055_vm5, %v2450_v22, 0 }
 0x183   : > { %v958_v31 = vadd.f32 %v2397_v28, %v949_v27 }
 0x185   : > { %v960_v34 = vmax.f32 %v958_v31, 0.0  ;;  %v2932_v31 = vld [vmem:[#allocation9 + $0x174] ss:$8 sps:$4 sm:$0xff]  }
 0x188   : > { %v944_v29 = vld [vmem:[#allocation2 + $0x10] ss:$2 sm:$0x3f]  ;;  %v948_v30 = vld [vmem:[#allocation2 + $0x11] ss:$2 sm:$0x3f] }
 0x189   : > { %v950_v32 = vmax.f32 %v944_v29, %v948_v30  ;;  %v2927_v29 = vld [vmem:[#allocation9 + $0x160] ss:$8 sps:$4 sm:$0xff]  }
 0x18b   : > { %v959_v33 = vadd.f32 %v2397_v28, %v950_v32  ;;  %v2929_v28 = vld [vmem:[#allocation9 + $0x164] ss:$8 sps:$4 sm:$0xff]   ;;  %v2930_v32 = vld [vmem:[#allocation9 + $0x170] ss:$8 sps:$4 sm:$0xff]  }
 0x18d   : > { %v961_v35 = vmax.f32 %v959_v33, 0.0  ;;  %v2935_v33 = vld [vmem:[#allocation9 + $0x184] ss:$8 sps:$4 sm:$0xff]  }
 0x18f   : > { %v962_v36 = vpack.c.bf16 %v961_v35, %v960_v34  ;;  %v2933_v34 = vld [vmem:[#allocation9 + $0x180] ss:$8 sps:$4 sm:$0xff]   ;;  %v2938_v35 = vld [vmem:[#allocation9 + $0x194] ss:$8 sps:$4 sm:$0xff]  }
 0x191   : > { %964 = vst.msk [vmem:[#allocation3] sm:$0x7f] %vm963_vm8, %v962_v36  ;;  %v2936_v36 = vld [vmem:[#allocation9 + $0x190] ss:$8 sps:$4 sm:$0xff]  }
 0x198   : > { %v977_v37 = vld [vmem:[#allocation3] sm:$0x7f] }
 0x199   : > { %v993_v38 = vshll.u32 %v977_v37, 16  ;;  %v991_v39 = vshrl.u32 %v977_v37, 16  ;;  %v965_v58 = vld [vmem:[#allocation3] sm:$0x3f] }
 0x19a   : > { %v1212_v8 = vld [vmem:[#allocation3] sm:$0x7e] }
 0x19b   : > { %v995_v40 = vrot.slane %v993_v38, 1  ;;  %v1226_v10 = vrot.slane %v1212_v8, 1  ;;  %v1338_v19 = vld [vmem:[#allocation3] sm:$0xfe]  ;;  %v1482_v38 = vld [vmem:[#allocation9 + $0x1b0] sm:$0x33] }
 0x19c   : > { %v1352_v23 = vshrl.u32 %v1338_v19, 16  ;;  %v1355_v24 = vshll.u32 %v1338_v19, 16  ;;  %v2941_v37 = vld [vmem:[#allocation9 + $0x1a4] ss:$8 sps:$4 sm:$0xff]  }
 0x19d   : > { %v996_v42 = vor.u32 %v995_v40, %v991_v39  ;;  %v2939_v39 = vld [vmem:[#allocation9 + $0x1a0] ss:$8 sps:$4 sm:$0xff]   ;;  %v2465_v40 = vcombine.high %v1482_v38, %v1482_v38 }
 0x19e   : > { %v1354_v26 = vrot.slane %v1352_v23, 1  ;;  %v1357_v27 = vrot.slane %v1355_v24, 2  ;;  %v2963_v19 = vld [vmem:[%s3611_s5 + $0x70] sm:$0xff]   ;;  %v2965_v23 = vld [vmem:[%s3611_s5 + $0xa8] sm:$0xff]  }
 0x19f   : > { %2411 = vmatmul.mubr.msk.bf16.vlgmr.msra.gmra.mrb[0].mxu1 %vm936_vm6, %v996_v42  ;;  %v1470_v42 = vld [vmem:[#allocation3] sm:$0xfc]  ;;  %v2966_v24 = vld [vmem:[%s3611_s5 + $0xb0] sm:$0xff]  }
 0x1a0   : > { %1170 = vmatpush1.bf16.msra.mxu1 %v2876_v41  ;;  %1201 = vmatprep.mubr.bf16.mxu1 %v3115_v0  ;;  %v1358_v30 = vor.u32 %v1357_v27, %v1354_v26  ;;  %v2464_v41 = vcombine.low %v1482_v38, %v1482_v38  ;;  %v2968_v26 = vld [vmem:[%s3611_s5 + $0xc0] sm:$0xff]  }
 0x1a1   : > { %1171 = vmatprep.subr.bf16.mxu1 %v2881_v43  ;;  %v1484_v43 = vrot.slane %v1470_v42, 2  ;;  %v2977_v38 = vld [vmem:[%s3615_s9] sm:$0xff]  }
 0x1a4   : > { %1172 = vmatpush1.bf16.msra.mxu1 %v2879_v44  ;;  %v2944_v44 = vld [vmem:[%s3611_s5 + $0x28] sm:$0xff]  }
 0x1a5   : > { %1173 = vmatprep.subr.bf16.mxu1 %v2884_v45  ;;  %v3116_v45 = vmov 0.0  }
 0x1a6   : > { %2604 = vmatprep.subr.bf16.mxu0 %v3116_v45  ;;  %2614 = vmatprep.mubr.msk.bf16.mxu0 %vm3117_vm9, %v3116_v45 }
 0x1a7   : > { %2605 = vmatpush3.bf16.msra.mxu0 %v2944_v44 }
 0x1a8   : > { %1174 = vmatpush1.bf16.msra.mxu1 %v2882_v46  ;;  %v2945_v46 = vld [vmem:[%s3611_s5 + $0x78] sm:$0xff]   ;;  %2606 = vmatprep.subr.bf16.mxu0 %v3116_v45 }
 0x1a9   : > { %1175 = vmatprep.subr.bf16.mxu1 %v2887_v47  ;;  %v2946_v47 = vld [vmem:[%s3611_s5 + $0x30] sm:$0xff]  }
 0x1ab   : > { %2607 = vmatpush3.bf16.msra.mxu0 %v2946_v47 }
 0x1ac   : > { %1176 = vmatpush1.bf16.msra.mxu1 %v2885_v48  ;;  %v2947_v48 = vld [vmem:[%s3611_s5 + $0x80] sm:$0xff]   ;;  %2608 = vmatprep.subr.bf16.mxu0 %v3116_v45 }
 0x1ad   : > { %1177 = vmatprep.subr.bf16.mxu1 %v2890_v49  ;;  %v2948_v49 = vld [vmem:[%s3611_s5 + $0x38] sm:$0xff]  }
 0x1af   : > { %2609 = vmatpush3.bf16.msra.mxu0 %v2948_v49 }
 0x1b0   : > { %1178 = vmatpush1.bf16.msra.mxu1 %v2888_v51  ;;  %2610 = vmatprep.subr.bf16.mxu0 %v3116_v45  ;;  %v2950_v51 = vld [vmem:[%s3611_s5 + $0x40] sm:$0xff]  }
 0x1b1   : > { %2424 = vmatprep.subr.msk.bf16.mxu1 %vm1055_vm5, %v2423_v52  ;;  %v2951_v52 = vld [vmem:[%s3611_s5 + $0x90] sm:$0xff]  }
 0x1b3   : > { %2611 = vmatpush3.bf16.msra.mxu0 %v2950_v51 }
 0x1b4   : > { %1180 = vmatpush1.bf16.msra.mxu1 %v1164_v54  ;;  %2612 = vmatprep.subr.bf16.mxu0 %v3116_v45  ;;  %v2953_v54 = vld [vmem:[%s3611_s5 + $0x98] sm:$0xff]  }
 0x1b5   : > { %1291 = vmatprep.subr.bf16.mxu1 %v2895_v55 }
 0x1b7   : > { %2425 = vmatmul.mubr.msk.bf16.vlgmr.msra.gmra.mrb[0].mxu1 %vm936_vm6, %v965_v58  ;;  %2613 = vmatpush3.bf16.msra.mxu0 %v2952_v53 }
 0x1b8   : > { %1292 = vmatpush1.bf16.msra.mxu1 %v2893_v56  ;;  %1323 = vmatprep.mubr.bf16.mxu1 %v3115_v0 }
 0x1b9   : > { %1293 = vmatprep.subr.bf16.mxu1 %v2898_v57  ;;  %2618 = vmatprep.subr.bf16.mxu0 %v3116_v45 }
 0x1bc   : > { %1294 = vmatpush1.bf16.msra.mxu1 %v2896_v59 }
 0x1bd   : > { %1295 = vmatprep.subr.bf16.mxu1 %v2901_v60 }
 0x1c0   : > { %1296 = vmatpush1.bf16.msra.mxu1 %v2899_v61  ;;  %v2468_v61 = vld [vmem:[%s3610_s4] ss:$0 sm:$0xff] }
 0x1c1   : > { %1297 = vmatprep.subr.bf16.mxu1 %v2904_v62 }
 0x1c4   : > { %1298 = vmatpush1.bf16.msra.mxu1 %v2902_v63 }
 0x1c5   : > { %1299 = vmatprep.subr.bf16.mxu1 %v2907_v1 }
 0x1c8   : > { %1300 = vmatpush1.bf16.msra.mxu1 %v2905_v3 }
 0x1c9   : > { %2438 = vmatprep.subr.msk.bf16.mxu1 %vm1055_vm5, %v2437_v4  ;;  %v2954_v4 = vld [vmem:[%s3611_s5] sm:$0xff]  }
 0x1cc   : > { %1302 = vmatpush1.bf16.msra.mxu1 %v1286_v6 }
 0x1cd   : > { %1423 = vmatprep.subr.bf16.mxu1 %v2912_v7 }
 0x1cf   : > { %2439 = vmatmul.mubr.msk.bf16.vlgmr.msra.gmra.mrb[0].mxu1 %vm936_vm6, %v1226_v10  ;;  %v2956_v10 = vld [vmem:[%s3611_s5 + $0x10] sm:$0xff]  }
 0x1d0   : > { %1424 = vmatpush1.bf16.msra.mxu1 %v2910_v9  ;;  %1455 = vmatprep.mubr.bf16.mxu1 %v3115_v0  ;;  %v2955_v9 = vld [vmem:[%s3611_s5 + $0x8] sm:$0xff]  }
 0x1d1   : > { %1425 = vmatprep.subr.bf16.mxu1 %v2915_v11  ;;  %v2957_v11 = vld [vmem:[%s3611_s5 + $0x18] sm:$0xff]  }
 0x1d4   : > { %1426 = vmatpush1.bf16.msra.mxu1 %v2913_v12  ;;  %v2958_v12 = vld [vmem:[%s3611_s5 + $0x20] sm:$0xff]  }
 0x1d5   : > { %1427 = vmatprep.subr.bf16.mxu1 %v2918_v13 }
 0x1d8   : > { %1428 = vmatpush1.bf16.msra.mxu1 %v2916_v14  ;;  %v2959_v14 = vld [vmem:[%s3611_s5 + $0x50] sm:$0xff]  }
 0x1d9   : > { %1429 = vmatprep.subr.bf16.mxu1 %v2921_v15 }
 0x1dc   : > { %1430 = vmatpush1.bf16.msra.mxu1 %v2919_v16  ;;  %v2960_v16 = vld [vmem:[%s3611_s5 + $0x58] sm:$0xff]  }
 0x1dd   : > { %1431 = vmatprep.subr.bf16.mxu1 %v2924_v17  ;;  %v2961_v17 = vld [vmem:[%s3611_s5 + $0x60] sm:$0xff]  }
 0x1e0   : > { %1432 = vmatpush1.bf16.msra.mxu1 %v2922_v20 }
 0x1e1   : > { %2452 = vmatprep.subr.msk.bf16.mxu1 %vm1055_vm5, %v2451_v21  ;;  %v2964_v21 = vld [vmem:[%s3611_s5 + $0xa0] sm:$0xff]  }
 0x1e4   : > { %1434 = vmatpush1.bf16.msra.mxu1 %v1418_v25  ;;  %v2967_v25 = vld [vmem:[%s3611_s5 + $0xb8] sm:$0xff]  }
 0x1e5   : > { %1549 = vmatprep.subr.bf16.mxu1 %v2929_v28 }
 0x1e7   : > { %2453 = vmatmul.mubr.msk.bf16.vlgmr.msra.gmra.mrb[0].mxu1 %vm936_vm6, %v1358_v30  ;;  %v2970_v30 = vld [vmem:[%s3613_s7 + $0x8] sm:$0xff]  }
 0x1e8   : > { %1550 = vmatpush1.bf16.msra.mxu1 %v2927_v29  ;;  %1581 = vmatprep.mubr.bf16.mxu1 %v3115_v0  ;;  %v1544_v0 = vsel %vm1055_vm5, %v2464_v41, 0  ;;  %v2969_v29 = vld [vmem:[%s3613_s7] sm:$0xff]   ;;  %v2980_v41 = vld [vmem:[%s3615_s9 + $0x18] sm:$0xff]  }
 0x1e9   : > { %1551 = vmatprep.subr.bf16.mxu1 %v2932_v31  ;;  %v2971_v31 = vld [vmem:[%s3613_s7 + $0x10] sm:$0xff]  }
 0x1ec   : > { %1552 = vmatpush1.bf16.msra.mxu1 %v2930_v32  ;;  %v2972_v32 = vld [vmem:[%s3613_s7 + $0x18] sm:$0xff]  }
 0x1ed   : > { %1553 = vmatprep.subr.bf16.mxu1 %v2935_v33  ;;  %v2973_v33 = vld [vmem:[%s3613_s7 + $0x20] sm:$0xff]  }
 0x1f0   : > { %1554 = vmatpush1.bf16.msra.mxu1 %v2933_v34  ;;  %v2974_v34 = vld [vmem:[%s3613_s7 + $0x28] sm:$0xff]  }
 0x1f1   : > { %1555 = vmatprep.subr.bf16.mxu1 %v2938_v35  ;;  %v2975_v35 = vld [vmem:[%s3613_s7 + $0x30] sm:$0xff]  }
 0x1f4   : > { %1556 = vmatpush1.bf16.msra.mxu1 %v2936_v36  ;;  %v2976_v36 = vld [vmem:[%s3613_s7 + $0x38] ss:$0 sps:$4 sm:$0xff]  }
 0x1f5   : > { %1557 = vmatprep.subr.bf16.mxu1 %v2941_v37  ;;  %v2124_v37 = vsel %vm2122_vm13, %v2976_v36, 0 }
 0x1f8   : > { %1558 = vmatpush1.bf16.msra.mxu1 %v2939_v39  ;;  %v2978_v39 = vld [vmem:[%s3615_s9 + $0x8] sm:$0xff]  }
 0x1f9   : > { %2466 = vmatprep.subr.msk.bf16.mxu1 %vm1055_vm5, %v2465_v40  ;;  %v2979_v40 = vld [vmem:[%s3615_s9 + $0x10] sm:$0xff]  }
 0x1fc   : > { %1560 = vmatpush1.bf16.msra.mxu1 %v1544_v0 }
 0x1fd   : > { %2646 = vmatprep.subr.bf16.mxu1 %v3116_v45 }
 0x1ff   : > { %2467 = vmatmul.mubr.msk.bf16.vlgmr.msra.gmra.mrb[0].mxu1 %vm936_vm6, %v1484_v43 }
 0x200   : > { %2647 = vmatpush3.bf16.msra.mxu1 %v2945_v46  ;;  %2656 = vmatprep.mubr.msk.bf16.mxu1 %vm3117_vm9, %v3116_v45 }
 0x201   : > { %2648 = vmatprep.subr.bf16.mxu1 %v3116_v45 }
 0x204   : > { %2649 = vmatpush3.bf16.msra.mxu1 %v2947_v48 }
 0x205   : > { %2650 = vmatprep.subr.bf16.mxu1 %v3116_v45 }
 0x208   : > { %2651 = vmatpush3.bf16.msra.mxu1 %v2949_v50 }
 0x209   : > { %2652 = vmatprep.subr.bf16.mxu1 %v3116_v45 }
 0x20c   : > { %2653 = vmatpush3.bf16.msra.mxu1 %v2951_v52 }
 0x20d   : > { %2654 = vmatprep.subr.bf16.mxu1 %v3116_v45 }
 0x210   : > { %2655 = vmatpush3.bf16.msra.mxu1 %v2953_v54 }
 0x211   : > { %2674 = vmatprep.subr.bf16.mxu1 %v3116_v45 }
 0x2d2   : > { %v1583_v55 = vpop.f32.mrb[0].mxu1 }
 0x2d3   : > { %v1585_v56 = vpop.f32.mrb[1].mxu1 }
 0x2d4   : > { %v1596_v57 = vmax.f32 %v1583_v55, %v1585_v56  ;;  %v1587_v58 = vpop.f32.mrb[2].mxu1 }
 0x2d5   : > { %v1589_v59 = vpop.f32.mrb[3].mxu1 }
 0x2d6   : > { %1599 = vst.msk [vmem:[#allocation4] sm:$0xff] %vm1598_vm10, %v1596_v57  ;;  %v1597_v60 = vmax.f32 %v1587_v58, %v1589_v59 }
 0x2d8   : > { %1601 = vst.msk [vmem:[#allocation4 + $0x8] sm:$0xf] %vm1600_vm11, %v1597_v60 }
 0x2df   : > { %v1602_v62 = vld [vmem:[#allocation4] ss:$2 sm:$0x3f]  ;;  %v1604_v63 = vld [vmem:[#allocation4 + $0x1] ss:$2 sm:$0x3f] }
 0x2e0   : > { %v1605_v1 = vmax.f32 %v1602_v62, %v1604_v63  ;;  %v2053_v62 = vld [vmem:[%s3612_s6] sm:$0x1] }
 0x2e2   : > { %v1613_v2 = vadd.f32 %v2468_v61, %v1605_v1 }
 0x2e4   : > { %v1614_v3 = vmax.f32 %v1613_v2, 0.0 }
 0x2e6   : > { %1616 = vst.msk [vmem:[#allocation5] sm:$0x3f] %vm1615_vm12, %v1614_v3 }
 0x2ed   : > { %v1630_v5 = vld [vmem:[#allocation5 + $0x1] ss:$8 sm:$0x1]  ;;  %v1878_v6 = vld [vmem:[#allocation5 + $0x3] ss:$8 sm:$0x1] }
 0x2ee   : > { %v1631_v7 = vpack.c.bf16 %v1630_v5, %v1630_v5  ;;  %v1879_v8 = vpack.c.bf16 %v1878_v6, %v1878_v6  ;;  %v1617_v13 = vld [vmem:[#allocation5] ss:$8 sm:$0x1]  ;;  %v1790_v20 = vld [vmem:[#allocation5 + $0x2] ss:$8 sm:$0x1] }
 0x2ef   : > { %v1618_v15 = vpack.c.bf16 %v1617_v13, %v1617_v13  ;;  %v1791_v22 = vpack.c.bf16 %v1790_v20, %v1790_v20  ;;  %v1966_v27 = vld [vmem:[#allocation5 + $0x4] ss:$8 sm:$0x1] }
 0x2f0   : > { %2615 = vmatmul.mubr.msk.bf16.vlgmr.msra.gmra.mrb[8].mxu0 %vm1598_vm10, %v1631_v7  ;;  %2657 = vmatmul.mubr.msk.bf16.vlgmr.msra.gmra.mrb[4].mxu1 %vm1598_vm10, %v1879_v8  ;;  %v1967_v28 = vpack.c.bf16 %v1966_v27, %v1966_v27  ;;  %v2981_v7 = vld [vmem:[%s3615_s9 + $0x20] sm:$0xff]   ;;  %v2982_v8 = vld [vmem:[%s3615_s9 + $0x28] ss:$0 sps:$4 sm:$0x33]  }
 0x2f1   : > { %2619 = vmatpush3.bf16.msra.mxu0 %v2954_v4  ;;  %2628 = vmatprep.mubr.msk.bf16.mxu0 %vm3117_vm9, %v3116_v45 }
 0x2f2   : > { %2620 = vmatprep.subr.bf16.mxu0 %v3116_v45  ;;  %2690 = vmatprep.mubr.msk.bf16.mxu1 %vm3117_vm9, %v3116_v45 }
 0x2f3   : > { %2675 = vmatpush3.bf16.msra.mxu1 %v2969_v29 }
 0x2f4   : > { %2676 = vmatprep.subr.bf16.mxu1 %v3116_v45 }
 0x2f5   : > { %2621 = vmatpush3.bf16.msra.mxu0 %v2955_v9  ;;  %v2217_v9 = vsel %vm1055_vm5, %v2982_v8, 0 }
 0x2f6   : > { %2622 = vmatprep.subr.bf16.mxu0 %v3116_v45 }
 0x2f7   : > { %2677 = vmatpush3.bf16.msra.mxu1 %v2970_v30 }
 0x2f8   : > { %2678 = vmatprep.subr.bf16.mxu1 %v3116_v45 }
 0x2f9   : > { %2623 = vmatpush3.bf16.msra.mxu0 %v2956_v10  ;;  %v2072_v10 = vld [vmem:[%s3614_s8] sm:$0x1] }
 0x2fa   : > { %2624 = vmatprep.subr.bf16.mxu0 %v3116_v45 }
 0x2fb   : > { %2679 = vmatpush3.bf16.msra.mxu1 %v2971_v31 }
 0x2fc   : > { %2680 = vmatprep.subr.bf16.mxu1 %v3116_v45 }
 0x2fd   : > { %2625 = vmatpush3.bf16.msra.mxu0 %v2957_v11 }
 0x2fe   : > { %2626 = vmatprep.subr.bf16.mxu0 %v3116_v45 }
 0x2ff   : > { %2681 = vmatpush3.bf16.msra.mxu1 %v2972_v32 }
 0x300   : > { %2682 = vmatprep.subr.bf16.mxu1 %v3116_v45 }
 0x301   : > { %2627 = vmatpush3.bf16.msra.mxu0 %v2958_v12 }
 0x302   : > { %2632 = vmatprep.subr.bf16.mxu0 %v3116_v45 }
 0x303   : > { %2683 = vmatpush3.bf16.msra.mxu1 %v2973_v33 }
 0x304   : > { %2629 = vmatmul.mubr.msk.bf16.vlgmr.msra.gmra.mrb[12].mxu0 %vm1598_vm10, %v1618_v15  ;;  %2684 = vmatprep.subr.bf16.mxu1 %v3116_v45 }
 0x305   : > { %2633 = vmatpush3.bf16.msra.mxu0 %v2959_v14  ;;  %2642 = vmatprep.mubr.msk.bf16.mxu0 %vm3117_vm9, %v3116_v45 }
 0x306   : > { %2634 = vmatprep.subr.bf16.mxu0 %v3116_v45 }
 0x307   : > { %2685 = vmatpush3.bf16.msra.mxu1 %v2974_v34 }
 0x308   : > { %2686 = vmatprep.subr.bf16.mxu1 %v3116_v45 }
 0x309   : > { %2635 = vmatpush3.bf16.msra.mxu0 %v2960_v16 }
 0x30a   : > { %2636 = vmatprep.subr.bf16.mxu0 %v3116_v45 }
 0x30b   : > { %2687 = vmatpush3.bf16.msra.mxu1 %v2975_v35 }
 0x30c   : > { %2688 = vmatprep.subr.bf16.mxu1 %v3116_v45 }
 0x30d   : > { %2637 = vmatpush3.bf16.msra.mxu0 %v2961_v17 }
 0x30e   : > { %2638 = vmatprep.subr.bf16.mxu0 %v3116_v45 }
 0x30f   : > { %2689 = vmatpush3.bf16.msra.mxu1 %v2124_v37 }
 0x311   : > { %2639 = vmatpush3.bf16.msra.mxu0 %v2962_v18 }
 0x312   : > { %2640 = vmatprep.subr.bf16.mxu0 %v3116_v45 }
 0x315   : > { %2641 = vmatpush3.bf16.msra.mxu0 %v2963_v19 }
 0x316   : > { %2660 = vmatprep.subr.bf16.mxu0 %v3116_v45 }
 0x318   : > { %2643 = vmatmul.mubr.msk.bf16.vlgmr.msra.gmra.mrb[16].mxu0 %vm1598_vm10, %v1791_v22 }
 0x319   : > { %2661 = vmatpush3.bf16.msra.mxu0 %v2964_v21  ;;  %2670 = vmatprep.mubr.msk.bf16.mxu0 %vm3117_vm9, %v3116_v45 }
 0x31a   : > { %2662 = vmatprep.subr.bf16.mxu0 %v3116_v45 }
 0x31d   : > { %2663 = vmatpush3.bf16.msra.mxu0 %v2965_v23 }
 0x31e   : > { %2664 = vmatprep.subr.bf16.mxu0 %v3116_v45 }
 0x321   : > { %2665 = vmatpush3.bf16.msra.mxu0 %v2966_v24 }
 0x322   : > { %2666 = vmatprep.subr.bf16.mxu0 %v3116_v45 }
 0x325   : > { %2667 = vmatpush3.bf16.msra.mxu0 %v2967_v25 }
 0x326   : > { %2668 = vmatprep.subr.bf16.mxu0 %v3116_v45 }
 0x329   : > { %2669 = vmatpush3.bf16.msra.mxu0 %v2968_v26 }
 0x32a   : > { %2694 = vmatprep.subr.bf16.mxu0 %v3116_v45 }
 0x32c   : > { %2671 = vmatmul.mubr.msk.bf16.vlgmr.msra.gmra.mrb[20].mxu0 %vm1598_vm10, %v1967_v28 }
 0x32d   : > { %2706 = vmatprep.mubr.msk.bf16.mxu0 %vm3117_vm9, %v3116_v45  ;;  %2695 = vmatpush3.bf16.msra.mxu0 %v2977_v38 }
 0x32e   : > { %2696 = vmatprep.subr.bf16.mxu0 %v3116_v45 }
 0x331   : > { %2697 = vmatpush3.bf16.msra.mxu0 %v2978_v39 }
 0x332   : > { %2698 = vmatprep.subr.bf16.mxu0 %v3116_v45 }
 0x335   : > { %2699 = vmatpush3.bf16.msra.mxu0 %v2979_v40 }
 0x336   : > { %2700 = vmatprep.subr.bf16.mxu0 %v3116_v45 }
 0x339   : > { %2701 = vmatpush3.bf16.msra.mxu0 %v2980_v41 }
 0x33a   : > { %2702 = vmatprep.subr.bf16.mxu0 %v3116_v45 }
 0x33d   : > { %2703 = vmatpush3.bf16.msra.mxu0 %v2981_v7 }
 0x33e   : > { %2704 = vmatprep.subr.bf16.mxu0 %v3116_v45  ;;  %v2179_v45 = vld [vmem:[%s3616_s10] sm:$0x1] }
 0x341   : > { %2705 = vmatpush3.bf16.msra.mxu0 %v2217_v9 }
 0x3c3   : > { %v1710_v0 = vpop.f32.mrb[8].mxu0  ;;  %v1958_v42 = vpop.f32.mrb[4].mxu1 }
 0x3c4   : > { %v2616_v43 = vpop.f32.mrb[9].mxu0  ;;  %v2658_v44 = vpop.f32.mrb[5].mxu1 }
 0x3c5   : > { %v1713_v46 = vpop.f32.mrb[10].mxu0  ;;  %v1961_v47 = vpop.f32.mrb[6].mxu1 }
 0x3c6   : > { %v2617_v48 = vpop.f32.mrb[11].mxu0  ;;  %v2659_v49 = vpop.f32.mrb[7].mxu1 }
 0x3d7   : > { %v1783_v50 = vpop.f32.mrb[12].mxu0 }
 0x3d8   : > { %v1784_v51 = vadd.f32 %v1783_v50, %v1710_v0  ;;  %v2630_v52 = vpop.f32.mrb[13].mxu0 }
 0x3d9   : > { %v1786_v53 = vpop.f32.mrb[14].mxu0 }
 0x3da   : > { %v2631_v54 = vpop.f32.mrb[15].mxu0 }
 0x3eb   : > { %v1870_v55 = vpop.f32.mrb[16].mxu0 }
 0x3ec   : > { %v1876_v56 = vadd.f32 %v1870_v55, %v1784_v51  ;;  %v2644_v57 = vpop.f32.mrb[17].mxu0 }
 0x3ed   : > { %v1873_v58 = vpop.f32.mrb[18].mxu0 }
 0x3ee   : > { %v2645_v59 = vpop.f32.mrb[19].mxu0  ;;  %v1964_v60 = vadd.f32 %v1958_v42, %v1876_v56 }
 0x3ff   : > { %v2046_v61 = vpop.f32.mrb[20].mxu0 }
 0x400   : > { %v2052_v63 = vadd.f32 %v2046_v61, %v1964_v60  ;;  %v2672_v1 = vpop.f32.mrb[21].mxu0 }
 0x401   : > { %v2049_v2 = vpop.f32.mrb[22].mxu0 }
 0x402   : > { %v2054_v3 = vadd.f32 %v2053_v62, %v2052_v63  ;;  %v2673_v4 = vpop.f32.mrb[23].mxu0 }
 0x404   : > { %v2055_v5 = vmax.f32 %v2054_v3, 0.0 }
 0x406   : > { %v2056_v6 = vpack.c.bf16 %v2055_v5, %v2055_v5 }
 0x408   : > { %2691 = vmatmul.mubr.msk.bf16.vlgmr.msra.gmra.mrb[8].mxu1 %vm2118_vm14, %v2056_v6 }
 0x4db   : > { %v2160_v11 = vpop.f32.mrb[8].mxu1 }
 0x4dc   : > { %v2161_v12 = vadd.f32 %v2160_v11, %v2072_v10  ;;  %v2692_v13 = vpop.f32.mrb[9].mxu1 }
 0x4dd   : > { %v2163_v14 = vpop.f32.mrb[10].mxu1 }
 0x4de   : > { %v2166_v15 = vmax.f32 %v2161_v12, 0.0  ;;  %v2693_v16 = vpop.f32.mrb[11].mxu1 }
 0x4e0   : > { %v2167_v17 = vpack.c.bf16 %v2166_v15, %v2166_v15 }
 0x4e2   : > { %2707 = vmatmul.mubr.msk.bf16.vlgmr.msra.gmra.mrb[24].mxu0 %vm936_vm6, %v2167_v17 }
 0x5b5   : > { %v2253_v18 = vpop.f32.mrb[24].mxu0 }
 0x5b6   : > { %v2254_v19 = vadd.f32 %v2253_v18, %v2179_v45  ;;  %v2708_v20 = vpop.f32.mrb[25].mxu0 }
 0x5b7   : > { %v2256_v21 = vpop.f32.mrb[26].mxu0 }
 0x5b8   : > { %v2709_v22 = vpop.f32.mrb[27].mxu0  ;;  %2260 = vst.msk [vmem:[%s409_s22] sm:$0x1] %vm2259_vm15, %v2254_v19 }
 0x5b9   : > { %3052 = shalt.err (!%p3049_p11)
}
 0x5ba   : > { %s3053_s23 = scalar_lea.hbm %s3564_s25, 16  ;;  %s3057_s13 = scalar_lea.hbm %s3617_s11, 32 }
 0x5bb   : > { %p3054_p13 = scmp.ne.s32.totalorder %s3564_s25, %s3053_s23  ;;  %p3058_p6 = scmp.lt.u32.totalorder %s3564_s25, %s3617_s11 }
 0x5bc   : > { %p3059_p9 = scmp.lt.u32.totalorder %s3057_s13, %s3053_s23  ;;  %p3061_p10 = scmp.lt.u32.totalorder %s3053_s23, %s3564_s25 }
 0x5bd   : > { %p3055_p5 = pnand %p3054_p13, %p3640_p1 }
 0x5be   : > { %p3060_p12 = por %p3059_p9, %p3058_p6 }
 0x5bf   : > { %p3056_p0 = pneg %p3055_p5 }
 0x5c0   : > { %p3062_p2 = por %p3061_p10, %p3060_p12 }
 0x5c2   : > { %p3063_p3 = pnand %p3062_p2, %p3056_p0 }
 0x5c4   : > { %3066 = shalt.err (!%p3063_p3)
}
 0x5c5   : > { %2766 = dma.vmem_to_hbm [thread:$0]  (%p3640_p1), %s3566_s19, 16, %s3564_s25, %s2262_s21  }
 0x5c6 PF: > { %s3641_s22 = sld [smem:[#allocation15_spill]]  ;;  %s3642_s26 = sld [smem:[#allocation19_spill]] }
 0x5c7   : > { %p2783_p4 = scmp.ge.s32.totalorder %s3109_s20, 2 }
 0x5cc   : > { %s2286_s24 = sand.u32 1, %s3641_s22   ;;  %p3643_p7 = scmp.ne.s32.totalorder %s3642_s26, 0 }
 0x5cd   : > { %s2287_s30 = scalar_lea.sflag [#allocation8], %s2286_s24 }
 0x5ce   : > { %p2776_p8 = pnand %p2783_p4, %p3643_p7 }
 0x5d0   : > { %3092 = dma.done.wait (!%p2776_p8), %s2287_s30, 16  }
 0x5d1   : > { %3094 = vsyncadd (!%p2776_p8), %s2287_s30, 4294967280  ;;  %s3644_s20 = sld [smem:[#allocation17_spill]]  ;;  %s3645_s14 = sld [smem:[#allocation16_spill]] }
 0x5d2   : > { %s3646_s19 = sld [smem:[#allocation18_spill]]  ;;  %s3647_s17 = smov %s3101_s18 }
 0x5d7   : > { %p23_p11 = scmp.ge.s32.totalorder %s3644_s20, 4   ;;  %s3648_s18 = smov %s3645_s14 }
 0x5d9   :  { %25 = sbr.rel (!%p23_p11) target bundleno = 5 (0x5), region = 128 }
 0x5e0   :  { %2291 = vsyncpa [#allocation7], 1 }
 0x5e1   :  { %2293 = vsyncpa [#allocation7 + $0x1], 1 }
 0x5e2   :  { %2294 = vsyncpa [#allocation10], 1 }
 0x5e3   :  { %2295 = vsyncpa [#allocation8], 1 }
 0x5e4   :  { %2297 = vsyncpa [#allocation8 + $0x1], 1 }

</bundles_post_ra>
